<compile_context>
chip_gen: v7x
topology: tpu7x:2x2x1
jax: 0.10.0
libtpu: 0.0.40
codegen_flags: <defaults>
</compile_context>

<pallas_src>
import functools

import jax
import jax.numpy as jnp
from jax.experimental import pallas as pl
from jax.experimental.pallas import tpu as pltpu


def _attention_kernel(x_ref, wqkv_ref, wp_ref, bp_ref,      # inputs
                      out_ref, attn_ref,                     # outputs
                      qkv_scr, ctx_scr,                      # VMEM scratch
                      *, num_heads, head_dim, scale):
    """One batch element per grid step.

    x_ref    : (1, N, C)   f32   input tokens
    wqkv_ref : (C, 3C)     bf16  fused qkv projection (jax convention y = x@W)
    wp_ref   : (C, C)      bf16  output projection
    bp_ref   : (1, C)      f32   output projection bias
    out_ref  : (1, N, C)         projected output
    attn_ref : (1, H, N, N)      softmax attention weights
    qkv_scr  : (N, 3C)     bf16  VMEM scratch holding fused q|k|v
    ctx_scr  : (N, C)      bf16  VMEM scratch holding concatenated head outputs
    """
    C = ctx_scr.shape[1]

    # ---- fused QKV projection: one full-width MXU matmul -----------------
    x = x_ref[0].astype(jnp.bfloat16)                               # [N, C]
    qkv_scr[...] = jnp.dot(x, wqkv_ref[...],
                           preferred_element_type=jnp.float32
                           ).astype(jnp.bfloat16)                   # [N, 3C]

    # ---- per-head attention (static head loop, static column slices) -----
    for h in range(num_heads):
        lo = h * head_dim
        hi = lo + head_dim
        q = qkv_scr[:, lo:hi]                                       # [N, hd] bf16
        k = qkv_scr[:, C + lo:C + hi]                               # [N, hd] bf16
        v = qkv_scr[:, 2 * C + lo:2 * C + hi]                       # [N, hd] bf16

        # scores = (q @ k^T) * scale  -> f32 [N, N]
        s = jax.lax.dot_general(q, k, (((1,), (1,)), ((), ())),
                                preferred_element_type=jnp.float32) * scale

        # numerically-stable softmax in f32
        s = s - jnp.max(s, axis=-1, keepdims=True)
        p = jnp.exp(s)
        p = p * pl.reciprocal(jnp.sum(p, axis=-1, keepdims=True), approx=True)

        attn_ref[0, h] = p.astype(attn_ref.dtype)

        # ctx_h = p @ v  -> write this head's columns into the [N, C] slab
        ctx = jnp.dot(p.astype(jnp.bfloat16), v,
                      preferred_element_type=jnp.float32)           # [N, hd]
        ctx_scr[:, lo:hi] = ctx.astype(jnp.bfloat16)

    # ---- single full-width output projection ------------------------------
    out = jnp.dot(ctx_scr[...], wp_ref[...],
                  preferred_element_type=jnp.float32) + bp_ref[...]  # [N, C]
    out_ref[0] = out.astype(out_ref.dtype)


def attention_pallas(x, wqkv, wproj, bproj, *, num_heads, qk_scale=None):
    """x: [B, N, C] f32.  wqkv: [C, 3C] (jax convention, y = x @ W).
    wproj: [C, C], bproj: [C]."""
    B, N, C = x.shape
    hd = C // num_heads
    if qk_scale is None:
        qk_scale = hd ** (-0.5)

    # bf16 weights: MXU-native operands, half the weight DMA bytes.
    wqkv_bf = wqkv.astype(jnp.bfloat16)
    wproj_bf = wproj.astype(jnp.bfloat16)
    bp = bproj.reshape(1, C).astype(jnp.float32)

    kernel = functools.partial(_attention_kernel, num_heads=num_heads,
                               head_dim=hd, scale=float(qk_scale))

    out_shapes = (
        jax.ShapeDtypeStruct((B, N, C), x.dtype),                 # projected output
        jax.ShapeDtypeStruct((B, num_heads, N, N), x.dtype),      # attention weights
    )

    grid_spec = pltpu.PrefetchScalarGridSpec(
        num_scalar_prefetch=0,
        grid=(B,),
        in_specs=[
            pl.BlockSpec((1, N, C), lambda b: (b, 0, 0)),          # x
            pl.BlockSpec((C, 3 * C), lambda b: (0, 0)),            # fused Wqkv (resident)
            pl.BlockSpec((C, C), lambda b: (0, 0)),                # Wproj (resident)
            pl.BlockSpec((1, C), lambda b: (0, 0)),                # bias
        ],
        out_specs=[
            pl.BlockSpec((1, N, C), lambda b: (b, 0, 0)),
            pl.BlockSpec((1, num_heads, N, N), lambda b: (b, 0, 0, 0)),
        ],
        scratch_shapes=[
            pltpu.VMEM((N, 3 * C), jnp.bfloat16),                  # fused qkv
            pltpu.VMEM((N, C), jnp.bfloat16),                      # ctx slab
        ],
    )

    return pl.pallas_call(
        kernel,
        out_shape=out_shapes,
        grid_spec=grid_spec,
        compiler_params=pltpu.CompilerParams(
            dimension_semantics=("parallel",),
            vmem_limit_bytes=48 * 1024 * 1024),
    )(x, wqkv_bf, wproj_bf, bp)


def attention_reference(x, wqkv, wproj, bproj, *, num_heads, qk_scale=None):
    """Pure-JAX f32 reference reproducing the PyTorch forward exactly."""
    B, N, C = x.shape
    hd = C // num_heads
    if qk_scale is None:
        qk_scale = hd ** (-0.5)
    qkv = x @ wqkv                                                  # [B, N, 3C]
    qkv = qkv.reshape(B, N, 3, num_heads, hd).transpose(2, 0, 3, 1, 4)
    q, k, v = qkv[0], qkv[1], qkv[2]                                # [B, H, N, hd]
    attn = jnp.einsum('bhnd,bhmd->bhnm', q, k) * qk_scale
    attn = jax.nn.softmax(attn, axis=-1)
    out = jnp.einsum('bhnm,bhmd->bhnd', attn, v)
    out = out.transpose(0, 2, 1, 3).reshape(B, N, C)
    out = out @ wproj + bproj
    return out, attn


if __name__ == "__main__":
    B, N, C, H = 2, 8, 32, 8          # head_dim = 4
    key = jax.random.PRNGKey(0)
    kx, kqkv, kp, kb = jax.random.split(key, 4)

    x = jax.random.normal(kx, (B, N, C), dtype=jnp.float32)
    # deterministic synthetic params (torch Linear-like scale, no checkpoint)
    bound = 1.0 / (C ** 0.5)
    wqkv = jax.random.uniform(kqkv, (C, 3 * C), jnp.float32, -bound, bound)
    wproj = jax.random.uniform(kp, (C, C), jnp.float32, -bound, bound)
    bproj = jax.random.uniform(kb, (C,), jnp.float32, -bound, bound)

    out, attn = attention_pallas(x, wqkv, wproj, bproj, num_heads=H)
    out = jax.block_until_ready(out)
    attn = jax.block_until_ready(attn)

    out_ref, attn_ref = attention_reference(x, wqkv, wproj, bproj, num_heads=H)
    assert out.shape == (B, N, C) and attn.shape == (B, H, N, N)
    # bf16 matmul operands (f32 accumulation) -> loosened tolerances vs f32 ref
    assert jnp.allclose(out, out_ref, atol=3e-2, rtol=3e-2)
    assert jnp.allclose(attn, attn_ref, atol=2e-2, rtol=3e-2)

    print("KERNEL_OK")
</pallas_src>

<mosaic_0001>
module attributes {stable_mosaic.version = 11 : i64} {
  func.func @_attention_kernel(%arg0: i32, %arg1: memref<1x8x32xf32, #tpu.memory_space<vmem>>, %arg2: memref<32x96xbf16, #tpu.memory_space<vmem>>, %arg3: memref<32x32xbf16, #tpu.memory_space<vmem>>, %arg4: memref<1x32xf32, #tpu.memory_space<vmem>>, %arg5: memref<1x8x32xf32, #tpu.memory_space<vmem>>, %arg6: memref<1x8x8x8xf32, #tpu.memory_space<vmem>>, %arg7: memref<8x96xbf16, #tpu.memory_space<vmem>>, %arg8: memref<8x32xbf16, #tpu.memory_space<vmem>>) attributes {dimension_semantics = [#tpu.dimension_semantics<parallel>], iteration_bounds = array<i64: 2>, scalar_prefetch = 0 : i64, scratch_operands = 2 : i64, tpu.core_type = #tpu.core_type<tc>, window_params = [{transform_indices = @transform_0, window_bounds = array<i64: 1, 8, 32>}, {pipeline_mode = #tpu.pipeline_mode<synchronous>, transform_indices = @transform_1, window_bounds = array<i64: 32, 96>}, {pipeline_mode = #tpu.pipeline_mode<synchronous>, transform_indices = @transform_2, window_bounds = array<i64: 32, 32>}, {pipeline_mode = #tpu.pipeline_mode<synchronous>, transform_indices = @transform_3, window_bounds = array<i64: 1, 32>}, {transform_indices = @transform_4, window_bounds = array<i64: 1, 8, 32>}, {transform_indices = @transform_5, window_bounds = array<i64: 1, 8, 8, 8>}]} {
    %c0 = arith.constant 0 : index
    %c0_0 = arith.constant 0 : index
    %c0_1 = arith.constant 0 : index
    %0 = vector.load %arg1[%c0, %c0_0, %c0_1] : memref<1x8x32xf32, #tpu.memory_space<vmem>>, vector<1x8x32xf32>
    %1 = vector.shape_cast %0 : vector<1x8x32xf32> to vector<8x32xf32>
    %2 = arith.truncf %1 : vector<8x32xf32> to vector<8x32xbf16>
    %c0_2 = arith.constant 0 : index
    %c0_3 = arith.constant 0 : index
    %3 = vector.load %arg2[%c0_2, %c0_3] : memref<32x96xbf16, #tpu.memory_space<vmem>>, vector<32x96xbf16>
    %cst = arith.constant dense<0.000000e+00> : vector<8x96xf32>
    %4 = tpu.matmul %2, %3, %cst {dimension_numbers = #tpu.dot_dimension_numbers<[1], [0], [0], [1], [0, 0, 1, 1], [], []>} : vector<8x32xbf16>, vector<32x96xbf16>, vector<8x96xf32> -> vector<8x96xf32>
    %5 = arith.truncf %4 : vector<8x96xf32> to vector<8x96xbf16>
    %c0_4 = arith.constant 0 : index
    %c0_5 = arith.constant 0 : index
    %6 = vector.load %arg7[%c0_4, %c0_5] : memref<8x96xbf16, #tpu.memory_space<vmem>>, vector<8x96xbf16>
    tpu.vector_store %arg7[%c0_4, %c0_5], %5 {strides = array<i32>} : memref<8x96xbf16, #tpu.memory_space<vmem>>, vector<8x96xbf16>,
    %c0_6 = arith.constant 0 : index
    %c0_7 = arith.constant 0 : index
    %7 = vector.load %arg7[%c0_6, %c0_7] : memref<8x96xbf16, #tpu.memory_space<vmem>>, vector<8x4xbf16>
    %c0_8 = arith.constant 0 : index
    %c32 = arith.constant 32 : index
    %8 = vector.load %arg7[%c0_8, %c32] : memref<8x96xbf16, #tpu.memory_space<vmem>>, vector<8x4xbf16>
    %c0_9 = arith.constant 0 : index
    %c64 = arith.constant 64 : index
    %9 = vector.load %arg7[%c0_9, %c64] : memref<8x96xbf16, #tpu.memory_space<vmem>>, vector<8x4xbf16>
    %cst_10 = arith.constant dense<0.000000e+00> : vector<8x8xf32>
    %10 = tpu.matmul %7, %8, %cst_10 {dimension_numbers = #tpu.dot_dimension_numbers<[1], [1], [0], [0], [0, 0, 1, 0], [], []>} : vector<8x4xbf16>, vector<8x4xbf16>, vector<8x8xf32> -> vector<8x8xf32>
    %cst_11 = arith.constant 5.000000e-01 : f32
    %11 = vector.broadcast %cst_11 : f32 to vector<8x8xf32>
    %12 = arith.mulf %10, %11 : vector<8x8xf32>
    %cst_12 = arith.constant dense<0xFF800000> : vector<8xf32>
    %13 = vector.multi_reduction <maximumf>, %12, %cst_12 [1] : vector<8x8xf32> to vector<8xf32>
    %14 = vector.shape_cast %13 : vector<8xf32> to vector<8x1xf32>
    %15 = vector.broadcast %14 : vector<8x1xf32> to vector<8x8xf32>
    %16 = arith.subf %12, %15 : vector<8x8xf32>
    %17 = math.exp %16 : vector<8x8xf32>
    %cst_13 = arith.constant dense<0.000000e+00> : vector<8xf32>
    %18 = vector.multi_reduction <add>, %17, %cst_13 [1] : vector<8x8xf32> to vector<8xf32>
    %19 = vector.shape_cast %18 : vector<8xf32> to vector<8x1xf32>
    %20 = tpu.reciprocal %19 {approx = true} : vector<8x1xf32> -> vector<8x1xf32>
    %21 = vector.broadcast %20 : vector<8x1xf32> to vector<8x8xf32>
    %22 = arith.mulf %17, %21 : vector<8x8xf32>
    %c0_14 = arith.constant 0 : index
    %c0_15 = arith.constant 0 : index
    %c0_16 = arith.constant 0 : index
    %c0_17 = arith.constant 0 : index
    %23 = vector.load %arg6[%c0_14, %c0_15, %c0_16, %c0_17] : memref<1x8x8x8xf32, #tpu.memory_space<vmem>>, vector<1x1x8x8xf32>
    %24 = vector.shape_cast %23 : vector<1x1x8x8xf32> to vector<8x8xf32>
    %25 = vector.shape_cast %22 : vector<8x8xf32> to vector<1x1x8x8xf32>
    tpu.vector_store %arg6[%c0_14, %c0_15, %c0_16, %c0_17], %25 {strides = array<i32>} : memref<1x8x8x8xf32, #tpu.memory_space<vmem>>, vector<1x1x8x8xf32>,
    %26 = arith.truncf %22 : vector<8x8xf32> to vector<8x8xbf16>
    %cst_18 = arith.constant dense<0.000000e+00> : vector<8x4xf32>
    %27 = tpu.matmul %26, %9, %cst_18 {dimension_numbers = #tpu.dot_dimension_numbers<[1], [0], [0], [1], [0, 0, 1, 1], [], []>} : vector<8x8xbf16>, vector<8x4xbf16>, vector<8x4xf32> -> vector<8x4xf32>
    %28 = arith.truncf %27 : vector<8x4xf32> to vector<8x4xbf16>
    %c0_19 = arith.constant 0 : index
    %c0_20 = arith.constant 0 : index
    %29 = vector.load %arg8[%c0_19, %c0_20] : memref<8x32xbf16, #tpu.memory_space<vmem>>, vector<8x4xbf16>
    tpu.vector_store %arg8[%c0_19, %c0_20], %28 {strides = array<i32>} : memref<8x32xbf16, #tpu.memory_space<vmem>>, vector<8x4xbf16>,
    %c0_21 = arith.constant 0 : index
    %c4 = arith.constant 4 : index
    %30 = vector.load %arg7[%c0_21, %c4] : memref<8x96xbf16, #tpu.memory_space<vmem>>, vector<8x4xbf16>
    %c0_22 = arith.constant 0 : index
    %c36 = arith.constant 36 : index
    %31 = vector.load %arg7[%c0_22, %c36] : memref<8x96xbf16, #tpu.memory_space<vmem>>, vector<8x4xbf16>
    %c0_23 = arith.constant 0 : index
    %c68 = arith.constant 68 : index
    %32 = vector.load %arg7[%c0_23, %c68] : memref<8x96xbf16, #tpu.memory_space<vmem>>, vector<8x4xbf16>
    %cst_24 = arith.constant dense<0.000000e+00> : vector<8x8xf32>
    %33 = tpu.matmul %30, %31, %cst_24 {dimension_numbers = #tpu.dot_dimension_numbers<[1], [1], [0], [0], [0, 0, 1, 0], [], []>} : vector<8x4xbf16>, vector<8x4xbf16>, vector<8x8xf32> -> vector<8x8xf32>
    %cst_25 = arith.constant 5.000000e-01 : f32
    %34 = vector.broadcast %cst_25 : f32 to vector<8x8xf32>
    %35 = arith.mulf %33, %34 : vector<8x8xf32>
    %cst_26 = arith.constant dense<0xFF800000> : vector<8xf32>
    %36 = vector.multi_reduction <maximumf>, %35, %cst_26 [1] : vector<8x8xf32> to vector<8xf32>
    %37 = vector.shape_cast %36 : vector<8xf32> to vector<8x1xf32>
    %38 = vector.broadcast %37 : vector<8x1xf32> to vector<8x8xf32>
    %39 = arith.subf %35, %38 : vector<8x8xf32>
    %40 = math.exp %39 : vector<8x8xf32>
    %cst_27 = arith.constant dense<0.000000e+00> : vector<8xf32>
    %41 = vector.multi_reduction <add>, %40, %cst_27 [1] : vector<8x8xf32> to vector<8xf32>
    %42 = vector.shape_cast %41 : vector<8xf32> to vector<8x1xf32>
    %43 = tpu.reciprocal %42 {approx = true} : vector<8x1xf32> -> vector<8x1xf32>
    %44 = vector.broadcast %43 : vector<8x1xf32> to vector<8x8xf32>
    %45 = arith.mulf %40, %44 : vector<8x8xf32>
    %c0_28 = arith.constant 0 : index
    %c1 = arith.constant 1 : index
    %c0_29 = arith.constant 0 : index
    %c0_30 = arith.constant 0 : index
    %46 = vector.load %arg6[%c0_28, %c1, %c0_29, %c0_30] : memref<1x8x8x8xf32, #tpu.memory_space<vmem>>, vector<1x1x8x8xf32>
    %47 = vector.shape_cast %46 : vector<1x1x8x8xf32> to vector<8x8xf32>
    %48 = vector.shape_cast %45 : vector<8x8xf32> to vector<1x1x8x8xf32>
    tpu.vector_store %arg6[%c0_28, %c1, %c0_29, %c0_30], %48 {strides = array<i32>} : memref<1x8x8x8xf32, #tpu.memory_space<vmem>>, vector<1x1x8x8xf32>,
    %49 = arith.truncf %45 : vector<8x8xf32> to vector<8x8xbf16>
    %cst_31 = arith.constant dense<0.000000e+00> : vector<8x4xf32>
    %50 = tpu.matmul %49, %32, %cst_31 {dimension_numbers = #tpu.dot_dimension_numbers<[1], [0], [0], [1], [0, 0, 1, 1], [], []>} : vector<8x8xbf16>, vector<8x4xbf16>, vector<8x4xf32> -> vector<8x4xf32>
    %51 = arith.truncf %50 : vector<8x4xf32> to vector<8x4xbf16>
    %c0_32 = arith.constant 0 : index
    %c4_33 = arith.constant 4 : index
    %52 = vector.load %arg8[%c0_32, %c4_33] : memref<8x32xbf16, #tpu.memory_space<vmem>>, vector<8x4xbf16>
    tpu.vector_store %arg8[%c0_32, %c4_33], %51 {strides = array<i32>} : memref<8x32xbf16, #tpu.memory_space<vmem>>, vector<8x4xbf16>,
    %c0_34 = arith.constant 0 : index
    %c8 = arith.constant 8 : index
    %53 = vector.load %arg7[%c0_34, %c8] : memref<8x96xbf16, #tpu.memory_space<vmem>>, vector<8x4xbf16>
    %c0_35 = arith.constant 0 : index
    %c40 = arith.constant 40 : index
    %54 = vector.load %arg7[%c0_35, %c40] : memref<8x96xbf16, #tpu.memory_space<vmem>>, vector<8x4xbf16>
    %c0_36 = arith.constant 0 : index
    %c72 = arith.constant 72 : index
    %55 = vector.load %arg7[%c0_36, %c72] : memref<8x96xbf16, #tpu.memory_space<vmem>>, vector<8x4xbf16>
    %cst_37 = arith.constant dense<0.000000e+00> : vector<8x8xf32>
    %56 = tpu.matmul %53, %54, %cst_37 {dimension_numbers = #tpu.dot_dimension_numbers<[1], [1], [0], [0], [0, 0, 1, 0], [], []>} : vector<8x4xbf16>, vector<8x4xbf16>, vector<8x8xf32> -> vector<8x8xf32>
    %cst_38 = arith.constant 5.000000e-01 : f32
    %57 = vector.broadcast %cst_38 : f32 to vector<8x8xf32>
    %58 = arith.mulf %56, %57 : vector<8x8xf32>
    %cst_39 = arith.constant dense<0xFF800000> : vector<8xf32>
    %59 = vector.multi_reduction <maximumf>, %58, %cst_39 [1] : vector<8x8xf32> to vector<8xf32>
    %60 = vector.shape_cast %59 : vector<8xf32> to vector<8x1xf32>
    %61 = vector.broadcast %60 : vector<8x1xf32> to vector<8x8xf32>
    %62 = arith.subf %58, %61 : vector<8x8xf32>
    %63 = math.exp %62 : vector<8x8xf32>
    %cst_40 = arith.constant dense<0.000000e+00> : vector<8xf32>
    %64 = vector.multi_reduction <add>, %63, %cst_40 [1] : vector<8x8xf32> to vector<8xf32>
    %65 = vector.shape_cast %64 : vector<8xf32> to vector<8x1xf32>
    %66 = tpu.reciprocal %65 {approx = true} : vector<8x1xf32> -> vector<8x1xf32>
    %67 = vector.broadcast %66 : vector<8x1xf32> to vector<8x8xf32>
    %68 = arith.mulf %63, %67 : vector<8x8xf32>
    %c0_41 = arith.constant 0 : index
    %c2 = arith.constant 2 : index
    %c0_42 = arith.constant 0 : index
    %c0_43 = arith.constant 0 : index
    %69 = vector.load %arg6[%c0_41, %c2, %c0_42, %c0_43] : memref<1x8x8x8xf32, #tpu.memory_space<vmem>>, vector<1x1x8x8xf32>
    %70 = vector.shape_cast %69 : vector<1x1x8x8xf32> to vector<8x8xf32>
    %71 = vector.shape_cast %68 : vector<8x8xf32> to vector<1x1x8x8xf32>
    tpu.vector_store %arg6[%c0_41, %c2, %c0_42, %c0_43], %71 {strides = array<i32>} : memref<1x8x8x8xf32, #tpu.memory_space<vmem>>, vector<1x1x8x8xf32>,
    %72 = arith.truncf %68 : vector<8x8xf32> to vector<8x8xbf16>
    %cst_44 = arith.constant dense<0.000000e+00> : vector<8x4xf32>
    %73 = tpu.matmul %72, %55, %cst_44 {dimension_numbers = #tpu.dot_dimension_numbers<[1], [0], [0], [1], [0, 0, 1, 1], [], []>} : vector<8x8xbf16>, vector<8x4xbf16>, vector<8x4xf32> -> vector<8x4xf32>
    %74 = arith.truncf %73 : vector<8x4xf32> to vector<8x4xbf16>
    %c0_45 = arith.constant 0 : index
    %c8_46 = arith.constant 8 : index
    %75 = vector.load %arg8[%c0_45, %c8_46] : memref<8x32xbf16, #tpu.memory_space<vmem>>, vector<8x4xbf16>
    tpu.vector_store %arg8[%c0_45, %c8_46], %74 {strides = array<i32>} : memref<8x32xbf16, #tpu.memory_space<vmem>>, vector<8x4xbf16>,
    %c0_47 = arith.constant 0 : index
    %c12 = arith.constant 12 : index
    %76 = vector.load %arg7[%c0_47, %c12] : memref<8x96xbf16, #tpu.memory_space<vmem>>, vector<8x4xbf16>
    %c0_48 = arith.constant 0 : index
    %c44 = arith.constant 44 : index
    %77 = vector.load %arg7[%c0_48, %c44] : memref<8x96xbf16, #tpu.memory_space<vmem>>, vector<8x4xbf16>
    %c0_49 = arith.constant 0 : index
    %c76 = arith.constant 76 : index
    %78 = vector.load %arg7[%c0_49, %c76] : memref<8x96xbf16, #tpu.memory_space<vmem>>, vector<8x4xbf16>
    %cst_50 = arith.constant dense<0.000000e+00> : vector<8x8xf32>
    %79 = tpu.matmul %76, %77, %cst_50 {dimension_numbers = #tpu.dot_dimension_numbers<[1], [1], [0], [0], [0, 0, 1, 0], [], []>} : vector<8x4xbf16>, vector<8x4xbf16>, vector<8x8xf32> -> vector<8x8xf32>
    %cst_51 = arith.constant 5.000000e-01 : f32
    %80 = vector.broadcast %cst_51 : f32 to vector<8x8xf32>
    %81 = arith.mulf %79, %80 : vector<8x8xf32>
    %cst_52 = arith.constant dense<0xFF800000> : vector<8xf32>
    %82 = vector.multi_reduction <maximumf>, %81, %cst_52 [1] : vector<8x8xf32> to vector<8xf32>
    %83 = vector.shape_cast %82 : vector<8xf32> to vector<8x1xf32>
    %84 = vector.broadcast %83 : vector<8x1xf32> to vector<8x8xf32>
    %85 = arith.subf %81, %84 : vector<8x8xf32>
    %86 = math.exp %85 : vector<8x8xf32>
    %cst_53 = arith.constant dense<0.000000e+00> : vector<8xf32>
    %87 = vector.multi_reduction <add>, %86, %cst_53 [1] : vector<8x8xf32> to vector<8xf32>
    %88 = vector.shape_cast %87 : vector<8xf32> to vector<8x1xf32>
    %89 = tpu.reciprocal %88 {approx = true} : vector<8x1xf32> -> vector<8x1xf32>
    %90 = vector.broadcast %89 : vector<8x1xf32> to vector<8x8xf32>
    %91 = arith.mulf %86, %90 : vector<8x8xf32>
    %c0_54 = arith.constant 0 : index
    %c3 = arith.constant 3 : index
    %c0_55 = arith.constant 0 : index
    %c0_56 = arith.constant 0 : index
    %92 = vector.load %arg6[%c0_54, %c3, %c0_55, %c0_56] : memref<1x8x8x8xf32, #tpu.memory_space<vmem>>, vector<1x1x8x8xf32>
    %93 = vector.shape_cast %92 : vector<1x1x8x8xf32> to vector<8x8xf32>
    %94 = vector.shape_cast %91 : vector<8x8xf32> to vector<1x1x8x8xf32>
    tpu.vector_store %arg6[%c0_54, %c3, %c0_55, %c0_56], %94 {strides = array<i32>} : memref<1x8x8x8xf32, #tpu.memory_space<vmem>>, vector<1x1x8x8xf32>,
    %95 = arith.truncf %91 : vector<8x8xf32> to vector<8x8xbf16>
    %cst_57 = arith.constant dense<0.000000e+00> : vector<8x4xf32>
    %96 = tpu.matmul %95, %78, %cst_57 {dimension_numbers = #tpu.dot_dimension_numbers<[1], [0], [0], [1], [0, 0, 1, 1], [], []>} : vector<8x8xbf16>, vector<8x4xbf16>, vector<8x4xf32> -> vector<8x4xf32>
    %97 = arith.truncf %96 : vector<8x4xf32> to vector<8x4xbf16>
    %c0_58 = arith.constant 0 : index
    %c12_59 = arith.constant 12 : index
    %98 = vector.load %arg8[%c0_58, %c12_59] : memref<8x32xbf16, #tpu.memory_space<vmem>>, vector<8x4xbf16>
    tpu.vector_store %arg8[%c0_58, %c12_59], %97 {strides = array<i32>} : memref<8x32xbf16, #tpu.memory_space<vmem>>, vector<8x4xbf16>,
    %c0_60 = arith.constant 0 : index
    %c16 = arith.constant 16 : index
    %99 = vector.load %arg7[%c0_60, %c16] : memref<8x96xbf16, #tpu.memory_space<vmem>>, vector<8x4xbf16>
    %c0_61 = arith.constant 0 : index
    %c48 = arith.constant 48 : index
    %100 = vector.load %arg7[%c0_61, %c48] : memref<8x96xbf16, #tpu.memory_space<vmem>>, vector<8x4xbf16>
    %c0_62 = arith.constant 0 : index
    %c80 = arith.constant 80 : index
    %101 = vector.load %arg7[%c0_62, %c80] : memref<8x96xbf16, #tpu.memory_space<vmem>>, vector<8x4xbf16>
    %cst_63 = arith.constant dense<0.000000e+00> : vector<8x8xf32>
    %102 = tpu.matmul %99, %100, %cst_63 {dimension_numbers = #tpu.dot_dimension_numbers<[1], [1], [0], [0], [0, 0, 1, 0], [], []>} : vector<8x4xbf16>, vector<8x4xbf16>, vector<8x8xf32> -> vector<8x8xf32>
    %cst_64 = arith.constant 5.000000e-01 : f32
    %103 = vector.broadcast %cst_64 : f32 to vector<8x8xf32>
    %104 = arith.mulf %102, %103 : vector<8x8xf32>
    %cst_65 = arith.constant dense<0xFF800000> : vector<8xf32>
    %105 = vector.multi_reduction <maximumf>, %104, %cst_65 [1] : vector<8x8xf32> to vector<8xf32>
    %106 = vector.shape_cast %105 : vector<8xf32> to vector<8x1xf32>
    %107 = vector.broadcast %106 : vector<8x1xf32> to vector<8x8xf32>
    %108 = arith.subf %104, %107 : vector<8x8xf32>
    %109 = math.exp %108 : vector<8x8xf32>
    %cst_66 = arith.constant dense<0.000000e+00> : vector<8xf32>
    %110 = vector.multi_reduction <add>, %109, %cst_66 [1] : vector<8x8xf32> to vector<8xf32>
    %111 = vector.shape_cast %110 : vector<8xf32> to vector<8x1xf32>
    %112 = tpu.reciprocal %111 {approx = true} : vector<8x1xf32> -> vector<8x1xf32>
    %113 = vector.broadcast %112 : vector<8x1xf32> to vector<8x8xf32>
    %114 = arith.mulf %109, %113 : vector<8x8xf32>
    %c0_67 = arith.constant 0 : index
    %c4_68 = arith.constant 4 : index
    %c0_69 = arith.constant 0 : index
    %c0_70 = arith.constant 0 : index
    %115 = vector.load %arg6[%c0_67, %c4_68, %c0_69, %c0_70] : memref<1x8x8x8xf32, #tpu.memory_space<vmem>>, vector<1x1x8x8xf32>
    %116 = vector.shape_cast %115 : vector<1x1x8x8xf32> to vector<8x8xf32>
    %117 = vector.shape_cast %114 : vector<8x8xf32> to vector<1x1x8x8xf32>
    tpu.vector_store %arg6[%c0_67, %c4_68, %c0_69, %c0_70], %117 {strides = array<i32>} : memref<1x8x8x8xf32, #tpu.memory_space<vmem>>, vector<1x1x8x8xf32>,
    %118 = arith.truncf %114 : vector<8x8xf32> to vector<8x8xbf16>
    %cst_71 = arith.constant dense<0.000000e+00> : vector<8x4xf32>
    %119 = tpu.matmul %118, %101, %cst_71 {dimension_numbers = #tpu.dot_dimension_numbers<[1], [0], [0], [1], [0, 0, 1, 1], [], []>} : vector<8x8xbf16>, vector<8x4xbf16>, vector<8x4xf32> -> vector<8x4xf32>
    %120 = arith.truncf %119 : vector<8x4xf32> to vector<8x4xbf16>
    %c0_72 = arith.constant 0 : index
    %c16_73 = arith.constant 16 : index
    %121 = vector.load %arg8[%c0_72, %c16_73] : memref<8x32xbf16, #tpu.memory_space<vmem>>, vector<8x4xbf16>
    tpu.vector_store %arg8[%c0_72, %c16_73], %120 {strides = array<i32>} : memref<8x32xbf16, #tpu.memory_space<vmem>>, vector<8x4xbf16>,
    %c0_74 = arith.constant 0 : index
    %c20 = arith.constant 20 : index
    %122 = vector.load %arg7[%c0_74, %c20] : memref<8x96xbf16, #tpu.memory_space<vmem>>, vector<8x4xbf16>
    %c0_75 = arith.constant 0 : index
    %c52 = arith.constant 52 : index
    %123 = vector.load %arg7[%c0_75, %c52] : memref<8x96xbf16, #tpu.memory_space<vmem>>, vector<8x4xbf16>
    %c0_76 = arith.constant 0 : index
    %c84 = arith.constant 84 : index
    %124 = vector.load %arg7[%c0_76, %c84] : memref<8x96xbf16, #tpu.memory_space<vmem>>, vector<8x4xbf16>
    %cst_77 = arith.constant dense<0.000000e+00> : vector<8x8xf32>
    %125 = tpu.matmul %122, %123, %cst_77 {dimension_numbers = #tpu.dot_dimension_numbers<[1], [1], [0], [0], [0, 0, 1, 0], [], []>} : vector<8x4xbf16>, vector<8x4xbf16>, vector<8x8xf32> -> vector<8x8xf32>
    %cst_78 = arith.constant 5.000000e-01 : f32
    %126 = vector.broadcast %cst_78 : f32 to vector<8x8xf32>
    %127 = arith.mulf %125, %126 : vector<8x8xf32>
    %cst_79 = arith.constant dense<0xFF800000> : vector<8xf32>
    %128 = vector.multi_reduction <maximumf>, %127, %cst_79 [1] : vector<8x8xf32> to vector<8xf32>
    %129 = vector.shape_cast %128 : vector<8xf32> to vector<8x1xf32>
    %130 = vector.broadcast %129 : vector<8x1xf32> to vector<8x8xf32>
    %131 = arith.subf %127, %130 : vector<8x8xf32>
    %132 = math.exp %131 : vector<8x8xf32>
    %cst_80 = arith.constant dense<0.000000e+00> : vector<8xf32>
    %133 = vector.multi_reduction <add>, %132, %cst_80 [1] : vector<8x8xf32> to vector<8xf32>
    %134 = vector.shape_cast %133 : vector<8xf32> to vector<8x1xf32>
    %135 = tpu.reciprocal %134 {approx = true} : vector<8x1xf32> -> vector<8x1xf32>
    %136 = vector.broadcast %135 : vector<8x1xf32> to vector<8x8xf32>
    %137 = arith.mulf %132, %136 : vector<8x8xf32>
    %c0_81 = arith.constant 0 : index
    %c5 = arith.constant 5 : index
    %c0_82 = arith.constant 0 : index
    %c0_83 = arith.constant 0 : index
    %138 = vector.load %arg6[%c0_81, %c5, %c0_82, %c0_83] : memref<1x8x8x8xf32, #tpu.memory_space<vmem>>, vector<1x1x8x8xf32>
    %139 = vector.shape_cast %138 : vector<1x1x8x8xf32> to vector<8x8xf32>
    %140 = vector.shape_cast %137 : vector<8x8xf32> to vector<1x1x8x8xf32>
    tpu.vector_store %arg6[%c0_81, %c5, %c0_82, %c0_83], %140 {strides = array<i32>} : memref<1x8x8x8xf32, #tpu.memory_space<vmem>>, vector<1x1x8x8xf32>,
    %141 = arith.truncf %137 : vector<8x8xf32> to vector<8x8xbf16>
    %cst_84 = arith.constant dense<0.000000e+00> : vector<8x4xf32>
    %142 = tpu.matmul %141, %124, %cst_84 {dimension_numbers = #tpu.dot_dimension_numbers<[1], [0], [0], [1], [0, 0, 1, 1], [], []>} : vector<8x8xbf16>, vector<8x4xbf16>, vector<8x4xf32> -> vector<8x4xf32>
    %143 = arith.truncf %142 : vector<8x4xf32> to vector<8x4xbf16>
    %c0_85 = arith.constant 0 : index
    %c20_86 = arith.constant 20 : index
    %144 = vector.load %arg8[%c0_85, %c20_86] : memref<8x32xbf16, #tpu.memory_space<vmem>>, vector<8x4xbf16>
    tpu.vector_store %arg8[%c0_85, %c20_86], %143 {strides = array<i32>} : memref<8x32xbf16, #tpu.memory_space<vmem>>, vector<8x4xbf16>,
    %c0_87 = arith.constant 0 : index
    %c24 = arith.constant 24 : index
    %145 = vector.load %arg7[%c0_87, %c24] : memref<8x96xbf16, #tpu.memory_space<vmem>>, vector<8x4xbf16>
    %c0_88 = arith.constant 0 : index
    %c56 = arith.constant 56 : index
    %146 = vector.load %arg7[%c0_88, %c56] : memref<8x96xbf16, #tpu.memory_space<vmem>>, vector<8x4xbf16>
    %c0_89 = arith.constant 0 : index
    %c88 = arith.constant 88 : index
    %147 = vector.load %arg7[%c0_89, %c88] : memref<8x96xbf16, #tpu.memory_space<vmem>>, vector<8x4xbf16>
    %cst_90 = arith.constant dense<0.000000e+00> : vector<8x8xf32>
    %148 = tpu.matmul %145, %146, %cst_90 {dimension_numbers = #tpu.dot_dimension_numbers<[1], [1], [0], [0], [0, 0, 1, 0], [], []>} : vector<8x4xbf16>, vector<8x4xbf16>, vector<8x8xf32> -> vector<8x8xf32>
    %cst_91 = arith.constant 5.000000e-01 : f32
    %149 = vector.broadcast %cst_91 : f32 to vector<8x8xf32>
    %150 = arith.mulf %148, %149 : vector<8x8xf32>
    %cst_92 = arith.constant dense<0xFF800000> : vector<8xf32>
    %151 = vector.multi_reduction <maximumf>, %150, %cst_92 [1] : vector<8x8xf32> to vector<8xf32>
    %152 = vector.shape_cast %151 : vector<8xf32> to vector<8x1xf32>
    %153 = vector.broadcast %152 : vector<8x1xf32> to vector<8x8xf32>
    %154 = arith.subf %150, %153 : vector<8x8xf32>
    %155 = math.exp %154 : vector<8x8xf32>
    %cst_93 = arith.constant dense<0.000000e+00> : vector<8xf32>
    %156 = vector.multi_reduction <add>, %155, %cst_93 [1] : vector<8x8xf32> to vector<8xf32>
    %157 = vector.shape_cast %156 : vector<8xf32> to vector<8x1xf32>
    %158 = tpu.reciprocal %157 {approx = true} : vector<8x1xf32> -> vector<8x1xf32>
    %159 = vector.broadcast %158 : vector<8x1xf32> to vector<8x8xf32>
    %160 = arith.mulf %155, %159 : vector<8x8xf32>
    %c0_94 = arith.constant 0 : index
    %c6 = arith.constant 6 : index
    %c0_95 = arith.constant 0 : index
    %c0_96 = arith.constant 0 : index
    %161 = vector.load %arg6[%c0_94, %c6, %c0_95, %c0_96] : memref<1x8x8x8xf32, #tpu.memory_space<vmem>>, vector<1x1x8x8xf32>
    %162 = vector.shape_cast %161 : vector<1x1x8x8xf32> to vector<8x8xf32>
    %163 = vector.shape_cast %160 : vector<8x8xf32> to vector<1x1x8x8xf32>
    tpu.vector_store %arg6[%c0_94, %c6, %c0_95, %c0_96], %163 {strides = array<i32>} : memref<1x8x8x8xf32, #tpu.memory_space<vmem>>, vector<1x1x8x8xf32>,
    %164 = arith.truncf %160 : vector<8x8xf32> to vector<8x8xbf16>
    %cst_97 = arith.constant dense<0.000000e+00> : vector<8x4xf32>
    %165 = tpu.matmul %164, %147, %cst_97 {dimension_numbers = #tpu.dot_dimension_numbers<[1], [0], [0], [1], [0, 0, 1, 1], [], []>} : vector<8x8xbf16>, vector<8x4xbf16>, vector<8x4xf32> -> vector<8x4xf32>
    %166 = arith.truncf %165 : vector<8x4xf32> to vector<8x4xbf16>
    %c0_98 = arith.constant 0 : index
    %c24_99 = arith.constant 24 : index
    %167 = vector.load %arg8[%c0_98, %c24_99] : memref<8x32xbf16, #tpu.memory_space<vmem>>, vector<8x4xbf16>
    tpu.vector_store %arg8[%c0_98, %c24_99], %166 {strides = array<i32>} : memref<8x32xbf16, #tpu.memory_space<vmem>>, vector<8x4xbf16>,
    %c0_100 = arith.constant 0 : index
    %c28 = arith.constant 28 : index
    %168 = vector.load %arg7[%c0_100, %c28] : memref<8x96xbf16, #tpu.memory_space<vmem>>, vector<8x4xbf16>
    %c0_101 = arith.constant 0 : index
    %c60 = arith.constant 60 : index
    %169 = vector.load %arg7[%c0_101, %c60] : memref<8x96xbf16, #tpu.memory_space<vmem>>, vector<8x4xbf16>
    %c0_102 = arith.constant 0 : index
    %c92 = arith.constant 92 : index
    %170 = vector.load %arg7[%c0_102, %c92] : memref<8x96xbf16, #tpu.memory_space<vmem>>, vector<8x4xbf16>
    %cst_103 = arith.constant dense<0.000000e+00> : vector<8x8xf32>
    %171 = tpu.matmul %168, %169, %cst_103 {dimension_numbers = #tpu.dot_dimension_numbers<[1], [1], [0], [0], [0, 0, 1, 0], [], []>} : vector<8x4xbf16>, vector<8x4xbf16>, vector<8x8xf32> -> vector<8x8xf32>
    %cst_104 = arith.constant 5.000000e-01 : f32
    %172 = vector.broadcast %cst_104 : f32 to vector<8x8xf32>
    %173 = arith.mulf %171, %172 : vector<8x8xf32>
    %cst_105 = arith.constant dense<0xFF800000> : vector<8xf32>
    %174 = vector.multi_reduction <maximumf>, %173, %cst_105 [1] : vector<8x8xf32> to vector<8xf32>
    %175 = vector.shape_cast %174 : vector<8xf32> to vector<8x1xf32>
    %176 = vector.broadcast %175 : vector<8x1xf32> to vector<8x8xf32>
    %177 = arith.subf %173, %176 : vector<8x8xf32>
    %178 = math.exp %177 : vector<8x8xf32>
    %cst_106 = arith.constant dense<0.000000e+00> : vector<8xf32>
    %179 = vector.multi_reduction <add>, %178, %cst_106 [1] : vector<8x8xf32> to vector<8xf32>
    %180 = vector.shape_cast %179 : vector<8xf32> to vector<8x1xf32>
    %181 = tpu.reciprocal %180 {approx = true} : vector<8x1xf32> -> vector<8x1xf32>
    %182 = vector.broadcast %181 : vector<8x1xf32> to vector<8x8xf32>
    %183 = arith.mulf %178, %182 : vector<8x8xf32>
    %c0_107 = arith.constant 0 : index
    %c7 = arith.constant 7 : index
    %c0_108 = arith.constant 0 : index
    %c0_109 = arith.constant 0 : index
    %184 = vector.load %arg6[%c0_107, %c7, %c0_108, %c0_109] : memref<1x8x8x8xf32, #tpu.memory_space<vmem>>, vector<1x1x8x8xf32>
    %185 = vector.shape_cast %184 : vector<1x1x8x8xf32> to vector<8x8xf32>
    %186 = vector.shape_cast %183 : vector<8x8xf32> to vector<1x1x8x8xf32>
    tpu.vector_store %arg6[%c0_107, %c7, %c0_108, %c0_109], %186 {strides = array<i32>} : memref<1x8x8x8xf32, #tpu.memory_space<vmem>>, vector<1x1x8x8xf32>,
    %187 = arith.truncf %183 : vector<8x8xf32> to vector<8x8xbf16>
    %cst_110 = arith.constant dense<0.000000e+00> : vector<8x4xf32>
    %188 = tpu.matmul %187, %170, %cst_110 {dimension_numbers = #tpu.dot_dimension_numbers<[1], [0], [0], [1], [0, 0, 1, 1], [], []>} : vector<8x8xbf16>, vector<8x4xbf16>, vector<8x4xf32> -> vector<8x4xf32>
    %189 = arith.truncf %188 : vector<8x4xf32> to vector<8x4xbf16>
    %c0_111 = arith.constant 0 : index
    %c28_112 = arith.constant 28 : index
    %190 = vector.load %arg8[%c0_111, %c28_112] : memref<8x32xbf16, #tpu.memory_space<vmem>>, vector<8x4xbf16>
    tpu.vector_store %arg8[%c0_111, %c28_112], %189 {strides = array<i32>} : memref<8x32xbf16, #tpu.memory_space<vmem>>, vector<8x4xbf16>,
    %c0_113 = arith.constant 0 : index
    %c0_114 = arith.constant 0 : index
    %191 = vector.load %arg8[%c0_113, %c0_114] : memref<8x32xbf16, #tpu.memory_space<vmem>>, vector<8x32xbf16>
    %c0_115 = arith.constant 0 : index
    %c0_116 = arith.constant 0 : index
    %192 = vector.load %arg3[%c0_115, %c0_116] : memref<32x32xbf16, #tpu.memory_space<vmem>>, vector<32x32xbf16>
    %cst_117 = arith.constant dense<0.000000e+00> : vector<8x32xf32>
    %193 = tpu.matmul %191, %192, %cst_117 {dimension_numbers = #tpu.dot_dimension_numbers<[1], [0], [0], [1], [0, 0, 1, 1], [], []>} : vector<8x32xbf16>, vector<32x32xbf16>, vector<8x32xf32> -> vector<8x32xf32>
    %c0_118 = arith.constant 0 : index
    %c0_119 = arith.constant 0 : index
    %194 = vector.load %arg4[%c0_118, %c0_119] : memref<1x32xf32, #tpu.memory_space<vmem>>, vector<1x32xf32>
    %195 = vector.broadcast %194 : vector<1x32xf32> to vector<8x32xf32>
    %196 = arith.addf %193, %195 : vector<8x32xf32>
    %c0_120 = arith.constant 0 : index
    %c0_121 = arith.constant 0 : index
    %c0_122 = arith.constant 0 : index
    %197 = vector.load %arg5[%c0_120, %c0_121, %c0_122] : memref<1x8x32xf32, #tpu.memory_space<vmem>>, vector<1x8x32xf32>
    %198 = vector.shape_cast %197 : vector<1x8x32xf32> to vector<8x32xf32>
    %199 = vector.shape_cast %196 : vector<8x32xf32> to vector<1x8x32xf32>
    tpu.vector_store %arg5[%c0_120, %c0_121, %c0_122], %199 {strides = array<i32>} : memref<1x8x32xf32, #tpu.memory_space<vmem>>, vector<1x8x32xf32>,
    return
  }
  func.func @transform_0(%arg0: i32) -> (i32, i32, i32) {
    %c0_i32 = arith.constant 0 : i32
    %c0_i32_0 = arith.constant 0 : i32
    %c0_i32_1 = arith.constant 0 : i32
    return %arg0, %c0_i32, %c0_i32_0 : i32, i32, i32
  }
  func.func @transform_1(%arg0: i32) -> (i32, i32) {
    %c0_i32 = arith.constant 0 : i32
    %c0_i32_0 = arith.constant 0 : i32
    %c0_i32_1 = arith.constant 0 : i32
    return %c0_i32, %c0_i32_0 : i32, i32
  }
  func.func @transform_2(%arg0: i32) -> (i32, i32) {
    %c0_i32 = arith.constant 0 : i32
    %c0_i32_0 = arith.constant 0 : i32
    %c0_i32_1 = arith.constant 0 : i32
    return %c0_i32, %c0_i32_0 : i32, i32
  }
  func.func @transform_3(%arg0: i32) -> (i32, i32) {
    %c0_i32 = arith.constant 0 : i32
    %c0_i32_0 = arith.constant 0 : i32
    %c0_i32_1 = arith.constant 0 : i32
    return %c0_i32, %c0_i32_0 : i32, i32
  }
  func.func @transform_4(%arg0: i32) -> (i32, i32, i32) {
    %c0_i32 = arith.constant 0 : i32
    %c0_i32_0 = arith.constant 0 : i32
    %c0_i32_1 = arith.constant 0 : i32
    return %arg0, %c0_i32, %c0_i32_0 : i32, i32, i32
  }
  func.func @transform_5(%arg0: i32) -> (i32, i32, i32, i32) {
    %c0_i32 = arith.constant 0 : i32
    %c0_i32_0 = arith.constant 0 : i32
    %c0_i32_1 = arith.constant 0 : i32
    %c0_i32_2 = arith.constant 0 : i32
    return %arg0, %c0_i32, %c0_i32_0, %c0_i32_1 : i32, i32, i32, i32
  }
}

</mosaic_0001>

<bundles_post_ra>
// kernel: tpu_custom_call.1
= control target key start
LH: loop header
LB: loop body
LE: loop exit
PB: predicated region body
PF: predicated region fallthrough
CT: control target
= control target key end

     0   :  { %11 = vsyncpa [#allocation5], 0  ;;  %s2686_s0 = inlined_call_operand.hbm [shape: f32[2,8,32], index: 0, kind: input, shape index: {}]   ;;  %s2687_s1 = inlined_call_operand.hbm [shape: bf16[32,96], index: 1, kind: input, shape index: {}]   ;;  %s2688_s2 = inlined_call_operand.hbm [shape: bf16[32,32], index: 2, kind: input, shape index: {}]   ;;  %s2689_s3 = inlined_call_operand.vmem [shape: f32[1,32], index: 3, kind: input, shape index: {}]   ;;  %s2690_s4 = inlined_call_operand.hbm [shape: f32[2,8,32], index: 4, kind: output, shape index: {0}]   ;;  %s2691_s5 = inlined_call_operand.hbm [shape: f32[2,8,8,8], index: 5, kind: output, shape index: {1}]  }
   0x1   :  { %13 = vsyncpa [#allocation5 + $0x1], 0 }
   0x2   :  { %14 = vsyncpa [#allocation8], 0 }
   0x3   :  { %15 = vsyncpa [#allocation6], 0 }
   0x4   :  { %17 = vsyncpa [#allocation6 + $0x1], 0 }
   0x5   :  { %18 = vsyncpa [#allocation12], 0 }
   0x6   :  { %20 = vsyncpa [#allocation12 + $0x1], 0  ;;  %s2206_s18 = smov 0   ;;  %s2208_s19 = smov 0  }
   0x7   :  { %s2210_s20 = smov 0   ;;  %s2212_s21 = smov 0  }
   0x8 LB: > { %s2227_s22 = sadd.s32 4294967295, %s2134_s21   ;;  %s1572_s23 = sadd.s32 4294967294, %s2134_s21   ;;  %s2134_s21 = sphi %s2212_s21, %s2711_s21   ;;  %s2130_s20 = sphi %s2210_s20, %s2710_s20   ;;  %s2126_s19 = sphi %s2208_s19, %s2709_s19   ;;  %s2122_s18 = sphi %s2206_s18, %s2708_s18  }
   0x9   : > { %p46_p0 = scmp.ne.s32.totalorder %s2126_s19, %s2122_s18  ;;  %p2692_p1 = scmp.eq.s32.totalorder %s2227_s22, 0 }
   0xa   : > { %p139_p3 = scmp.eq.s32.totalorder %s1572_s23, 1  ;;  %p1573_p5 = scmp.ge.s32.totalorder %s2134_s21, 1 }
   0xb   : > { %p2236_p4 = por %p2692_p1, %p46_p0  ;;  %p172_p7 = scmp.lt.s32.totalorder %s2134_s21, 3 }
   0xc   : > { %p2241_p6 = por %p139_p3, %p46_p0  ;;  %s2136_s27 = smov [#allocation7]  }
   0xd   : > { %s2695_s24 = scalar_select %p2236_p4, 1, 0 }
   0xe   : > { %s2696_s25 = scalar_select %p2241_p6, 1, 0 }
   0xf   : > { %p2246_p8 = pnand %p1573_p5, %p172_p7  ;;  %s184_s28 = sshll.u32 %s2136_s27, 4  ;;  %s2250_s28 = int_to_ptr.vmem [resolvable:$true] %s184_s28 }
  0x10   : > { %s2137_s30 = smov [#allocation9]   ;;  %s1946_s9 = scalar_lea.hbm %s2687_s1, 256 }
  0x11   : > { %p1809_p9 = pneg %p2246_p8  ;;  %s197_s6 = sshll.u32 %s2137_s30, 4  ;;  %s2261_s6 = int_to_ptr.vmem [resolvable:$true] %s197_s6 }
  0x12   : > { %p1947_p12 = scmp.ne.s32.totalorder %s2687_s1, %s1946_s9  ;;  %p1953_p5 = scmp.lt.u32.totalorder %s1946_s9, %s2687_s1 }
  0x13   : > { %p2257_p11 = pnand %p1809_p9, %p2692_p1 }
  0x15   : > { %p1948_p13 = pneg %p2257_p11 }
  0x17   : > { %p1949_p0 = pnand %p1948_p13, %p1947_p12 }
  0x19   : > { %p1950_p3 = pneg %p1949_p0 }
  0x1b   : > { %p1955_p7 = pnand %p1953_p5, %p1950_p3 }
  0x1d   : > { %1958 = shalt.err (!%p1955_p7)
}
  0x1e   : > { %s1959_s14 = scalar_lea.vmem %s2250_s28, 256  ;;  %p1967_p2 = scmp.lt.s32.totalorder %s2250_s28, %s2250_s28 }
  0x1f   : > { %p1960_p9 = scmp.ne.s32.totalorder %s2250_s28, %s1959_s14  ;;  %p1968_p12 = scmp.lt.s32.totalorder %s1959_s14, %s1959_s14 }
  0x21   : > { %p1962_p10 = pnand %p1960_p9, %p1948_p13  ;;  %p1969_p0 = por %p1968_p12, %p1967_p2 }
  0x23   : > { %p1963_p1 = pneg %p1962_p10 }
  0x25   : > { %p1970_p6 = pnand %p1969_p0, %p1963_p1 }
  0x27   : > { %1973 = shalt.err (!%p1970_p6)
}
  0x28   : > { %s2138_s15 = smov 64   ;;  %s2139_s16 = smov 4  }
  0x29   : > { %1812 = dma.hbm_to_vmem [thread:$0]  (!%p2257_p11), %s2687_s1, 256, %s2250_s28, [#allocation8], %s2138_s15, %s2138_s15, %s2139_s16  }
  0x2a   : > { %s1974_s7 = scalar_lea.hbm %s2688_s2, 256 }
  0x2b   : > { %p1975_p2 = scmp.ne.s32.totalorder %s2688_s2, %s1974_s7  ;;  %p1981_p10 = scmp.lt.u32.totalorder %s1974_s7, %s2688_s2 }
  0x2d   : > { %p1977_p1 = pnand %p1975_p2, %p1948_p13 }
  0x2f   : > { %p1978_p6 = pneg %p1977_p1 }
  0x31   : > { %p1983_p3 = pnand %p1981_p10, %p1978_p6 }
  0x33   : > { %1986 = shalt.err (!%p1983_p3)
}
  0x34   : > { %s1987_s28 = scalar_lea.vmem %s2261_s6, 256  ;;  %p1995_p12 = scmp.lt.s32.totalorder %s2261_s6, %s2261_s6 }
  0x35   : > { %p1988_p5 = scmp.ne.s32.totalorder %s2261_s6, %s1987_s28  ;;  %p1996_p0 = scmp.lt.s32.totalorder %s1987_s28, %s1987_s28 }
  0x37   : > { %p1990_p7 = pnand %p1988_p5, %p1948_p13  ;;  %p1997_p2 = por %p1996_p0, %p1995_p12 }
  0x39   : > { %p1991_p9 = pneg %p1990_p7 }
  0x3b   : > { %p1998_p1 = pnand %p1997_p2, %p1991_p9 }
  0x3d   : > { %2001 = shalt.err (!%p1998_p1)
}
  0x3e   : > { %1815 = dma.hbm_to_vmem [thread:$0]  (!%p2257_p11), %s2688_s2, 256, %s2261_s6, [#allocation8], %s2138_s15, %s2138_s15, %s2139_s16  }
  0x3f   : > { %s2316_s14 = sadd.s32 1, %s2134_s21   ;;  %s33_s29 = sadd.s32 1, %s2130_s20 }
  0x40   : > { %s30_s17 = ssub.s32 %s2134_s21, %s2316_s14  ;;  %p40_p13 = scmp.ne.s32.totalorder %s2130_s20, %s2126_s19 }
  0x41   : > { %p31_p6 = scmp.eq.s32.totalorder %s30_s17, 0  ;;  %p41_p10 = scmp.eq.s32.totalorder %s2134_s21, 0 }
  0x42   : > { %p2699_p3 = scmp.eq.s32.totalorder %s2227_s22, 1  ;;  %p1829_p7 = scmp.lt.s32.totalorder %s2134_s21, 2 }
  0x43   : > { %s2332_s27 = scalar_select %p31_p6, %s2130_s20, %s33_s29  }
  0x44   : > { %p2326_p5 = por %p2699_p3, %p40_p13  ;;  %p42_p9 = por %p41_p10, %p40_p13 }
  0x45   : > { %s214_s30 = sand.u32 1, %s2130_s20   ;;  %s1578_s6 = sshll.u32 %s2134_s21, 7 }
  0x46   : > { %s2700_s23 = scalar_select %p2326_p5, 1, 0 }
  0x47   : > { %s1577_s7 = sshll.u32 %s214_s30, 3  ;;  %s2339_s8 = scalar_lea.hbm %s2686_s0, %s1578_s6 }
  0x48   : > { %s218_s9 = scalar_lea.vmem [#allocation4], %s1577_s7  ;;  %p2343_p11 = pnand %p1829_p7, %p42_p9 }
  0x49   : > { %s225_s10 = sshll.u32 %s218_s9, 4  ;;  %s215_s28 = scalar_lea.sflag [#allocation5], %s214_s30  ;;  %s2341_s10 = int_to_ptr.vmem [resolvable:$true] %s225_s10 }
  0x4a   : > { %s2002_s12 = scalar_lea.hbm %s2339_s8, 128  ;;  %p2004_p0 = pneg %p2343_p11 }
  0x4b   : > { %p2003_p12 = scmp.ne.s32.totalorder %s2339_s8, %s2002_s12  ;;  %s2007_s17 = scalar_lea.hbm %s2686_s0, 256 }
  0x4c   : > { %p2008_p13 = scmp.lt.u32.totalorder %s2339_s8, %s2686_s0  ;;  %p2009_p6 = scmp.lt.u32.totalorder %s2007_s17, %s2002_s12 }
  0x4d   : > { %p2005_p2 = pnand %p2004_p0, %p2003_p12  ;;  %p2011_p3 = scmp.lt.u32.totalorder %s2002_s12, %s2339_s8 }
  0x4e   : > { %p2010_p10 = por %p2009_p6, %p2008_p13 }
  0x4f   : > { %p2006_p1 = pneg %p2005_p2 }
  0x50   : > { %p2012_p7 = por %p2011_p3, %p2010_p10 }
  0x52   : > { %p2013_p9 = pnand %p2012_p7, %p2006_p1 }
  0x54   : > { %2016 = shalt.err (!%p2013_p9)
}
  0x55   : > { %s2017_s30 = scalar_lea.vmem %s2341_s10, 128  ;;  %s2140_s15 = smov [#allocation4]  }
  0x56   : > { %p2018_p12 = scmp.ne.s32.totalorder %s2341_s10, %s2017_s30  ;;  %s2022_s16 = sshll.u32 %s2140_s15, 4  ;;  %s2023_s16 = int_to_ptr.vmem [resolvable:$false] %s2022_s16 }
  0x57   : > { %s2024_s9 = scalar_lea.vmem %s2023_s16, 256  ;;  %p2025_p4 = scmp.lt.s32.totalorder %s2341_s10, %s2023_s16 }
  0x58   : > { %p2020_p2 = pnand %p2018_p12, %p2004_p0  ;;  %p2026_p13 = scmp.lt.s32.totalorder %s2024_s9, %s2017_s30 }
  0x5a   : > { %p2021_p5 = pneg %p2020_p2  ;;  %p2027_p6 = por %p2026_p13, %p2025_p4 }
  0x5c   : > { %p2028_p10 = pnand %p2027_p6, %p2021_p5 }
  0x5e   : > { %2031 = shalt.err (!%p2028_p10)
}
  0x5f   : > { %1819 = dma.hbm_to_vmem [thread:$0]  (!%p2343_p11), %s2339_s8, 128, %s2341_s10, %s215_s28  }
  0x60   : > { %234 = sbr.rel (%p2246_p8) target bundleno = 1670 (0x686), region = 36  ;;  %s2375_s12 = sand.u32 (!%p2246_p8), 1, %s2126_s19  }
  0x61   : > { %s1580_s13 = sshll.u32 (!%p2246_p8), %s2375_s12, 3  ;;  %s237_s29 = scalar_lea.sflag (!%p2246_p8), [#allocation5], %s2375_s12 }
  0x62   : > { %s240_s17 = scalar_lea.vmem (!%p2246_p8), [#allocation4], %s1580_s13  ;;  %p2702_p4 = scmp.ne.s32.totalorder (!%p2246_p8), %s2695_s24, 0 }
  0x67   : > { %2105 = dma.done.wait (%p2702_p4), %s237_s29, 128  }
  0x68   : > { %2107 = vsyncadd (%p2702_p4), %s237_s29, 4294967168  ;;  %p2703_p5 = scmp.eq.s32.totalorder %s2227_s22, 0 }
  0x6a   : > { %2109 = dma.done.wait (%p2703_p5), [#allocation8], 512   ;;  %p2704_p8 = pmov %p2703_p5 }
  0x6b   : > { %v2141_v0 = vmov 0.0   ;;  %vm2142_vm0 = vmmov 0   ;;  %v1902_v1 = vld [vmem:[#allocation7] sm:$0xff]   ;;  %v1903_v2 = vld [vmem:[#allocation7 + $0x8] sm:$0xff]   ;;  %v281_v3 = vld [vmem:[%s240_s17] sm:$0xff]  ;;  %vm299_vm1 = vcmask 261120  }
  0x6c   : > { %2111 = vsyncadd (%p2704_p8), [#allocation8], 4294966784  ;;  %1683 = vmatprep.subr.bf16.mxu0 %v2141_v0  ;;  %1687 = vmatprep.mubr.msk.bf16.mxu0 %vm2142_vm0, %v2141_v0  ;;  %v282_v4 = vpack.c.bf16 %v281_v3, %v281_v3  ;;  %vm344_vm2 = vcmask 781312   ;;  %s2143_s24 = smov 124   ;;  %s2144_s26 = smov 96   ;;  %vm352_vm3 = vcmask 31744  }
  0x6d   : > { %1691 = vmatprep.subr.bf16.mxu1 %v2141_v0  ;;  %1693 = vmatprep.mubr.msk.bf16.mxu1 %vm2142_vm0, %v2141_v0  ;;  %s2145_s8 = smov 88   ;;  %s2146_s10 = smov 92   ;;  %vm400_vm4 = vcmask 64512   ;;  %vm419_vm5 = vcmask 1043456   ;;  %vm464_vm6 = vcmask 27648   ;;  %vm590_vm7 = vcmask 60448  }
  0x6e   : > { %1684 = vmatpush3.bf16.msra.mxu0 %v1902_v1  ;;  %s2147_s11 = smov 84   ;;  %s2148_s28 = smov 120   ;;  %vm716_vm8 = vcmask 93248   ;;  %vm842_vm9 = vcmask 126048   ;;  %vm968_vm10 = vcmask 158848   ;;  %vm1094_vm11 = vcmask 191648  }
  0x6f   : > { %1685 = vmatprep.subr.bf16.mxu0 %v2141_v0  ;;  %s2149_s7 = smov 80   ;;  %s2150_s6 = smov 116   ;;  %vm1220_vm12 = vcmask 224448   ;;  %vm1346_vm13 = vcmask 257248  }
  0x70   : > { %s2151_s30 = smov 76   ;;  %s2152_s15 = smov 112  }
  0x71   : > { %s2153_s16 = smov 72   ;;  %s2154_s9 = smov 108  }
  0x72   : > { %1686 = vmatpush3.bf16.msra.mxu0 %v1903_v2  ;;  %s2155_s29 = smov 68   ;;  %s2156_s17 = smov 104  }
  0x73   : > { %1697 = vmatprep.subr.bf16.mxu0 %v2141_v0  ;;  %p2705_p0 = scmp.ne.s32.totalorder %s2700_s23, 0 }
  0x75   : > { %1688 = vmatmul.mubr.msk.bf16.vlgmr.msra.gmra.mrb[0].mxu0 %vm299_vm1, %v282_v4 }
  0x76   : > { %1699 = vmatprep.mubr.msk.bf16.mxu0 %vm2142_vm0, %v2141_v0 }
 0x148   : > { %v337_v5 = vpop.f32.mrb[0].mxu0 }
 0x149   : > { %v343_v6 = vpack.c.bf16 %v337_v5, %v337_v5  ;;  %v1689_v7 = vpop.f32.mrb[1].mxu0 }
 0x14a   : > { %v340_v8 = vpop.f32.mrb[2].mxu0 }
 0x14b   : > { %345 = vst.msk [vmem:[#allocation2] sm:$0xf] %vm344_vm2, %v343_v6  ;;  %v1690_v9 = vpop.f32.mrb[3].mxu0 }
 0x152   : > { %v2400_v10 = vld [vmem:[#allocation2] ss:$0 sps:$4 sm:$0xff]  }
 0x153   : > { %v346_v11 = vld [vmem:[#allocation2] sm:$0xf]  ;;  %470 = vrot.lane.b32.xlu1 %v2400_v10, %s2143_s24  ;;  %s2157_s24 = smov 100  }
 0x154   : > { %v2402_v12 = vcombine.low %v346_v11, %v346_v11  ;;  %v2406_v13 = vld [vmem:[#allocation2] ss:$0 sps:$4 sm:$0xff]  }
 0x155   : > { %v2410_v14 = vld [vmem:[#allocation2] ss:$0 sps:$4 sm:$0xff]  }
 0x156   : > { %350 = vrot.lane.b32.xlu0 %v2402_v12, %s2144_s26  ;;  %v2414_v15 = vld [vmem:[#allocation2] ss:$0 sps:$4 sm:$0xff]   ;;  %s2158_s26 = smov 60  }
 0x157   : > { %598 = vrot.lane.b32.xlu1 %v2406_v13, %s2145_s8  ;;  %v2418_v16 = vld [vmem:[#allocation2] ss:$0 sps:$4 sm:$0xff]   ;;  %s2159_s8 = smov 64  }
 0x158   : > { %v2422_v17 = vld [vmem:[#allocation2] ss:$0 sps:$4 sm:$0xff]  }
 0x159   : > { %v2426_v18 = vld [vmem:[#allocation2] ss:$0 sps:$4 sm:$0xff]  }
 0x15a   : > { %472 = vrot.lane.b32.xlu0 %v2400_v10, %s2146_s10  ;;  %s2160_s10 = smov 56  }
 0x15b   : > { %724 = vrot.lane.b32.xlu1 %v2410_v14, %s2147_s11  ;;  %s2161_s11 = smov 52  }
 0x15e   : > { %596 = vrot.lane.b32.xlu0 %v2406_v13, %s2148_s28  ;;  %s2162_s28 = smov 44  }
 0x15f   : > { %850 = vrot.lane.b32.xlu1 %v2414_v15, %s2149_s7  ;;  %s2163_s7 = smov 40  }
 0x162   : > { %722 = vrot.lane.b32.xlu0 %v2410_v14, %s2150_s6  ;;  %s2164_s6 = smov 36  }
 0x163   : > { %976 = vrot.lane.b32.xlu1 %v2418_v16, %s2151_s30  ;;  %s2165_s30 = smov 48  }
 0x166   : > { %848 = vrot.lane.b32.xlu0 %v2414_v15, %s2152_s15  ;;  %s1584_s15 = sshll.u32 %s2375_s12, 6 }
 0x167   : > { %1102 = vrot.lane.b32.xlu1 %v2422_v17, %s2153_s16  ;;  %s2535_s16 = scalar_lea.vmem [#allocation11], %s1584_s15  ;;  %s1422_s15 = scalar_lea.sflag [#allocation12], %s2375_s12 }
 0x16a   : > { %974 = vrot.lane.b32.xlu0 %v2418_v16, %s2154_s9  ;;  %s2166_s9 = smov 4  }
 0x16b   : > { %1228 = vrot.lane.b32.xlu1 %v2426_v18, %s2155_s29  ;;  %s2167_s29 = smov 8  }
 0x16e   : > { %1100 = vrot.lane.b32.xlu0 %v2422_v17, %s2156_s17  ;;  %s2168_s17 = smov 12  }
 0x172   : > { %1226 = vrot.lane.b32.xlu0 %v2426_v18, %s2157_s24  ;;  %s2169_s24 = smov 16  }
 0x1c5   : > { %v471_v22 = vpop.permute.xlu1 %470 }
 0x1c8   : > { %v351_v19 = vpop.permute.xlu0 %350 }
 0x1c9   : > { %v357_v20 = vsel %vm352_vm3, %v351_v19, 0  ;;  %v599_v24 = vpop.permute.xlu1 %598 }
 0x1ca   : > { %1692 = vmatpush3.bf16.xpose.msra.mxu1 %v357_v20  ;;  %v604_v25 = vsel %vm352_vm3, %v599_v24, 0 }
 0x1cb   : > { %1703 = vmatprep.subr.bf16.mxu1 %v2141_v0 }
 0x1cc   : > { %v473_v21 = vpop.permute.xlu0 %472 }
 0x1cd   : > { %v478_v23 = vsel %vm352_vm3, %v473_v21, 0  ;;  %v725_v26 = vpop.permute.xlu1 %724 }
 0x1ce   : > { %v730_v28 = vsel %vm352_vm3, %v725_v26, 0 }
 0x1d0   : > { %v597_v27 = vpop.permute.xlu0 %596 }
 0x1d1   : > { %1694 = vmatmul.mubr.msk.bf16.vlgmr.msra.gmra.mrb[0].mxu1 %vm352_vm3, %v346_v11  ;;  %v851_v29 = vpop.permute.xlu1 %850 }
 0x1d2   : > { %1704 = vmatpush3.bf16.xpose.msra.mxu1 %v478_v23  ;;  %1705 = vmatprep.mubr.msk.bf16.mxu1 %vm2142_vm0, %v2141_v0  ;;  %v856_v31 = vsel %vm352_vm3, %v851_v29, 0 }
 0x1d3   : > { %1715 = vmatprep.subr.bf16.mxu1 %v2141_v0 }
 0x1d4   : > { %v723_v30 = vpop.permute.xlu0 %722 }
 0x1d5   : > { %v977_v32 = vpop.permute.xlu1 %976 }
 0x1d6   : > { %v982_v34 = vsel %vm352_vm3, %v977_v32, 0 }
 0x1d8   : > { %v849_v33 = vpop.permute.xlu0 %848 }
 0x1d9   : > { %1706 = vmatmul.mubr.msk.bf16.vlgmr.msra.gmra.mrb[4].mxu1 %vm352_vm3, %v471_v22  ;;  %v1103_v35 = vpop.permute.xlu1 %1102 }
 0x1da   : > { %1716 = vmatpush3.bf16.xpose.msra.mxu1 %v604_v25  ;;  %1717 = vmatprep.mubr.msk.bf16.mxu1 %vm2142_vm0, %v2141_v0  ;;  %v1108_v37 = vsel %vm352_vm3, %v1103_v35, 0 }
 0x1db   : > { %1727 = vmatprep.subr.bf16.mxu1 %v2141_v0 }
 0x1dc   : > { %v975_v36 = vpop.permute.xlu0 %974 }
 0x1dd   : > { %v1229_v38 = vpop.permute.xlu1 %1228 }
 0x1de   : > { %v1234_v40 = vsel %vm352_vm3, %v1229_v38, 0 }
 0x1e0   : > { %v1101_v39 = vpop.permute.xlu0 %1100 }
 0x1e1   : > { %1718 = vmatmul.mubr.msk.bf16.vlgmr.msra.gmra.mrb[8].mxu1 %vm352_vm3, %v597_v27 }
 0x1e2   : > { %1728 = vmatpush3.bf16.xpose.msra.mxu1 %v730_v28  ;;  %1729 = vmatprep.mubr.msk.bf16.mxu1 %vm2142_vm0, %v2141_v0 }
 0x1e3   : > { %1739 = vmatprep.subr.bf16.mxu1 %v2141_v0 }
 0x1e4   : > { %v1227_v41 = vpop.permute.xlu0 %1226 }
 0x1e9   : > { %1730 = vmatmul.mubr.msk.bf16.vlgmr.msra.gmra.mrb[12].mxu1 %vm352_vm3, %v723_v30 }
 0x1ea   : > { %1740 = vmatpush3.bf16.xpose.msra.mxu1 %v856_v31  ;;  %1741 = vmatprep.mubr.msk.bf16.mxu1 %vm2142_vm0, %v2141_v0 }
 0x1eb   : > { %1751 = vmatprep.subr.bf16.mxu1 %v2141_v0 }
 0x1f1   : > { %1742 = vmatmul.mubr.msk.bf16.vlgmr.msra.gmra.mrb[16].mxu1 %vm352_vm3, %v849_v33 }
 0x1f2   : > { %1752 = vmatpush3.bf16.xpose.msra.mxu1 %v982_v34  ;;  %1753 = vmatprep.mubr.msk.bf16.mxu1 %vm2142_vm0, %v2141_v0 }
 0x1f3   : > { %1763 = vmatprep.subr.bf16.mxu1 %v2141_v0 }
 0x1f9   : > { %1754 = vmatmul.mubr.msk.bf16.vlgmr.msra.gmra.mrb[20].mxu1 %vm352_vm3, %v975_v36 }
 0x1fa   : > { %1764 = vmatpush3.bf16.xpose.msra.mxu1 %v1108_v37  ;;  %1765 = vmatprep.mubr.msk.bf16.mxu1 %vm2142_vm0, %v2141_v0 }
 0x1fb   : > { %1775 = vmatprep.subr.bf16.mxu1 %v2141_v0 }
 0x201   : > { %1766 = vmatmul.mubr.msk.bf16.vlgmr.msra.gmra.mrb[24].mxu1 %vm352_vm3, %v1101_v39 }
 0x202   : > { %1776 = vmatpush3.bf16.xpose.msra.mxu1 %v1234_v40  ;;  %1777 = vmatprep.mubr.msk.bf16.mxu1 %vm2142_vm0, %v2141_v0 }
 0x203   : > { %1787 = vmatprep.subr.bf16.mxu1 %v2141_v0 }
 0x209   : > { %1778 = vmatmul.mubr.msk.bf16.vlgmr.msra.gmra.mrb[28].mxu1 %vm352_vm3, %v1227_v41 }
 0x20a   : > { %1791 = vmatprep.mubr.msk.bf16.mxu1 %vm2142_vm0, %v2141_v0 }
 0x2a4   : > { %v393_v42 = vpop.f32.mrb[0].mxu1 }
 0x2a5   : > { %v2471_v43 = vmul.f32 0.5, %v393_v42  ;;  %v1695_v44 = vpop.f32.mrb[1].mxu1 }
 0x2a6   : > { %v396_v45 = vpop.f32.mrb[2].mxu1 }
 0x2a7   : > { %v1696_v46 = vpop.f32.mrb[3].mxu1  ;;  %v401_v47 = vsel %vm400_vm4, %v2471_v43, -inf }
 0x2a8   : > { %402 = vmax.xlane.f32.xlu1 %v401_v47 }
 0x2ac   : > { %v514_v48 = vpop.f32.mrb[4].mxu1 }
 0x2ad   : > { %v520_v49 = vmul.f32 0.5, %v514_v48  ;;  %v1707_v50 = vpop.f32.mrb[5].mxu1 }
 0x2ae   : > { %v517_v51 = vpop.f32.mrb[6].mxu1 }
 0x2af   : > { %v1708_v52 = vpop.f32.mrb[7].mxu1  ;;  %v521_v53 = vsel %vm400_vm4, %v520_v49, -inf }
 0x2b0   : > { %522 = vmax.xlane.f32.xlu0 %v521_v53 }
 0x2b4   : > { %v640_v54 = vpop.f32.mrb[8].mxu1 }
 0x2b5   : > { %v646_v55 = vmul.f32 0.5, %v640_v54  ;;  %v1719_v56 = vpop.f32.mrb[9].mxu1 }
 0x2b6   : > { %v643_v57 = vpop.f32.mrb[10].mxu1 }
 0x2b7   : > { %v1720_v58 = vpop.f32.mrb[11].mxu1  ;;  %v647_v59 = vsel %vm400_vm4, %v646_v55, -inf }
 0x2b8   : > { %648 = vmax.xlane.f32.xlu0 %v647_v59 }
 0x2bc   : > { %v766_v60 = vpop.f32.mrb[12].mxu1 }
 0x2bd   : > { %v772_v61 = vmul.f32 0.5, %v766_v60  ;;  %v1731_v62 = vpop.f32.mrb[13].mxu1 }
 0x2be   : > { %v769_v63 = vpop.f32.mrb[14].mxu1 }
 0x2bf   : > { %v1732_v1 = vpop.f32.mrb[15].mxu1  ;;  %v773_v2 = vsel %vm400_vm4, %v772_v61, -inf }
 0x2c0   : > { %774 = vmax.xlane.f32.xlu1 %v773_v2 }
 0x2c4   : > { %v892_v3 = vpop.f32.mrb[16].mxu1 }
 0x2c5   : > { %v898_v4 = vmul.f32 0.5, %v892_v3  ;;  %v1743_v5 = vpop.f32.mrb[17].mxu1 }
 0x2c6   : > { %v895_v6 = vpop.f32.mrb[18].mxu1 }
 0x2c7   : > { %v1744_v7 = vpop.f32.mrb[19].mxu1  ;;  %v899_v8 = vsel %vm400_vm4, %v898_v4, -inf }
 0x2c8   : > { %900 = vmax.xlane.f32.xlu0 %v899_v8 }
 0x2cc   : > { %v1018_v9 = vpop.f32.mrb[20].mxu1 }
 0x2cd   : > { %v2479_v11 = vmul.f32 0.5, %v1018_v9  ;;  %v1755_v19 = vpop.f32.mrb[21].mxu1 }
 0x2ce   : > { %v1021_v20 = vpop.f32.mrb[22].mxu1 }
 0x2cf   : > { %v1756_v21 = vpop.f32.mrb[23].mxu1  ;;  %v1025_v22 = vsel %vm400_vm4, %v2479_v11, -inf }
 0x2d0   : > { %1026 = vmax.xlane.f32.xlu1 %v1025_v22 }
 0x2d4   : > { %v1144_v23 = vpop.f32.mrb[24].mxu1 }
 0x2d5   : > { %v1150_v24 = vmul.f32 0.5, %v1144_v23  ;;  %v1767_v25 = vpop.f32.mrb[25].mxu1 }
 0x2d6   : > { %v1147_v26 = vpop.f32.mrb[26].mxu1 }
 0x2d7   : > { %v1768_v27 = vpop.f32.mrb[27].mxu1  ;;  %v1151_v28 = vsel %vm400_vm4, %v1150_v24, -inf }
 0x2d8   : > { %1152 = vmax.xlane.f32.xlu0 %v1151_v28 }
 0x2dc   : > { %v1270_v29 = vpop.f32.mrb[28].mxu1 }
 0x2dd   : > { %v1779_v30 = vpop.f32.mrb[29].mxu1  ;;  %v2486_v33 = vmul.f32 0.5, %v1270_v29 }
 0x2de   : > { %v1273_v31 = vpop.f32.mrb[30].mxu1 }
 0x2df   : > { %v1780_v32 = vpop.f32.mrb[31].mxu1  ;;  %v1277_v34 = vsel %vm400_vm4, %v2486_v33, -inf }
 0x2e1   : > { %535 = vrot.lane.b32.xlu1 %v2400_v10, %s2158_s26  ;;  %s2170_s26 = smov 20  }
 0x2ee   : > { %414 = vrot.lane.b32.xlu0 %v2402_v12, %s2159_s8  ;;  %s2171_s8 = smov 24  }
 0x305   : > { %1278 = vmax.xlane.f32.xlu1 %v1277_v34 }
 0x316   : > { %661 = vrot.lane.b32.xlu1 %v2406_v13, %s2160_s10  ;;  %s2172_s10 = smov 28  }
 0x335   : > { %v403_v35 = vpop.xlane.xlu1 %402 }
 0x336   : > { %v404_v36 = vsub.f32 %v2471_v43, %v403_v35 }
 0x338   : > { %v405_v37 = vmul.f32 1.442695, %v404_v36 }
 0x33a   : > { %1914 = vpow2.f32 %v405_v37 }
 0x33d   : > { %v523_v38 = vpop.xlane.xlu0 %522 }
 0x33e   : > { %v524_v39 = vsub.f32 %v520_v49, %v523_v38 }
 0x340   : > { %v525_v10 = vmul.f32 1.442695, %v524_v39 }
 0x342   : > { %1916 = vpow2.f32 %v525_v10 }
 0x344   : > { %v2492_v40 = vpop.eup %1914 }
 0x345   : > { %v649_v12 = vpop.xlane.xlu0 %648  ;;  %v407_v41 = vsel %vm400_vm4, %v2492_v40, 0.0 }
 0x346   : > { %v650_v42 = vsub.f32 %v646_v55, %v649_v12  ;;  %408 = vadd.xlane.f32.xlu0 %v407_v41 }
 0x348   : > { %v651_v44 = vmul.f32 1.442695, %v650_v42 }
 0x34a   : > { %1918 = vpow2.f32 %v651_v44 }
 0x34c   : > { %v2496_v13 = vpop.eup %1916 }
 0x34d   : > { %v775_v45 = vpop.xlane.xlu1 %774  ;;  %v527_v43 = vsel %vm400_vm4, %v2496_v13, 0.0 }
 0x34e   : > { %v776_v46 = vsub.f32 %v772_v61, %v775_v45  ;;  %528 = vadd.xlane.f32.xlu1 %v527_v43 }
 0x350   : > { %v777_v47 = vmul.f32 1.442695, %v776_v46 }
 0x352   : > { %1920 = vpow2.f32 %v777_v47 }
 0x354   : > { %v2500_v48 = vpop.eup %1918 }
 0x355   : > { %v901_v49 = vpop.xlane.xlu0 %900  ;;  %v653_v50 = vsel %vm400_vm4, %v2500_v48, 0.0 }
 0x356   : > { %v902_v51 = vsub.f32 %v898_v4, %v901_v49  ;;  %654 = vadd.xlane.f32.xlu0 %v653_v50 }
 0x358   : > { %v903_v52 = vmul.f32 1.442695, %v902_v51 }
 0x35a   : > { %1922 = vpow2.f32 %v903_v52 }
 0x35c   : > { %v2504_v53 = vpop.eup %1920 }
 0x35d   : > { %v779_v54 = vsel %vm400_vm4, %v2504_v53, 0.0  ;;  %v1027_v62 = vpop.xlane.xlu1 %1026 }
 0x35e   : > { %780 = vadd.xlane.f32.xlu1 %v779_v54  ;;  %v1028_v1 = vsub.f32 %v2479_v11, %v1027_v62 }
 0x360   : > { %v1029_v3 = vmul.f32 1.442695, %v1028_v1 }
 0x364   : > { %v2508_v55 = vpop.eup %1922 }
 0x365   : > { %v1153_v56 = vpop.xlane.xlu0 %1152  ;;  %v905_v57 = vsel %vm400_vm4, %v2508_v55, 0.0 }
 0x366   : > { %v1154_v58 = vsub.f32 %v1150_v24, %v1153_v56  ;;  %906 = vadd.xlane.f32.xlu1 %v905_v57 }
 0x368   : > { %v1155_v59 = vmul.f32 1.442695, %v1154_v58 }
 0x369   : > { %v415_v60 = vpop.permute.xlu0 %414 }
 0x36a   : > { %1924 = vpow2.f32 %v1155_v59  ;;  %v421_v61 = vsel %vm419_vm5, %v415_v60, 0 }
 0x36b   : > { %1698 = vmatpush3.bf16.msra.mxu0 %v421_v61  ;;  %1926 = vpow2.f32 %v1029_v3 }
 0x36c   : > { %787 = vrot.lane.b32.xlu0 %v2410_v14, %s2161_s11  ;;  %1709 = vmatprep.subr.bf16.mxu0 %v2141_v0  ;;  %v536_v14 = vpop.permute.xlu1 %535  ;;  %s1644_s11 = sshll.u32 %s2227_s22, 10 }
 0x374   : > { %v2515_v63 = vpop.eup %1924 }
 0x375   : > { %v1157_v2 = vsel %vm400_vm4, %v2515_v63, 0.0  ;;  %v2520_v4 = vpop.eup %1926 }
 0x376   : > { %1158 = vadd.xlane.f32.xlu1 %v1157_v2  ;;  %v1031_v5 = vsel %vm400_vm4, %v2520_v4, 0.0 }
 0x38b   : > { %1032 = vadd.xlane.f32.xlu0 %v1031_v5 }
 0x392   : > { %v1279_v6 = vpop.xlane.xlu1 %1278 }
 0x393   : > { %v1280_v7 = vsub.f32 %v2486_v33, %v1279_v6 }
 0x395   : > { %v1281_v8 = vmul.f32 1.442695, %v1280_v7 }
 0x396   : > { %v662_v20 = vpop.permute.xlu1 %661 }
 0x397   : > { %1928 = vpow2.f32 %v1281_v8  ;;  %v667_v26 = vsel %vm419_vm5, %v662_v20, 0 }
 0x3a1   : > { %v2525_v9 = vpop.eup %1928  ;;  %1039 = vrot.lane.b32.xlu0 %v2418_v16, %s2162_s28 }
 0x3a2   : > { %v1283_v11 = vsel %vm400_vm4, %v2525_v9, 0.0 }
 0x3a3   : > { %1284 = vadd.xlane.f32.xlu1 %v1283_v11 }
 0x3a5   : > { %1165 = vrot.lane.b32.xlu0 %v2422_v17, %s2163_s7 }
 0x3a9   : > { %1291 = vrot.lane.b32.xlu0 %v2426_v18, %s2164_s6  ;;  %v541_v18 = vsel %vm419_vm5, %v536_v14, 0  ;;  %s2602_s6 = scalar_lea.hbm %s2691_s5, %s1644_s11 }
 0x3b4   : > { %913 = vrot.lane.b32.xlu1 %v2414_v15, %s2165_s30  ;;  %s1448_s30 = sshll.u32 %s2535_s16, 4  ;;  %s2605_s30 = int_to_ptr.vmem [resolvable:$true] %s1448_s30 }
 0x3d3   : > { %v409_v19 = vpop.xlane.xlu0 %408 }
 0x3d4   : > { %1930 = vrcp.f32 %v409_v19 }
 0x3db   : > { %v529_v21 = vpop.xlane.xlu1 %528 }
 0x3dc   : > { %1932 = vrcp.f32 %v529_v21 }
 0x3de   : > { %v1931_v16 = vpop.eup %1930 }
 0x3df   : > { %v411_v22 = vmul.f32 %v1931_v16, %v2492_v40 }
 0x3e1   : > { %412 = vst.msk [vmem:[%s2535_s16] sm:$0xff] %vm400_vm4, %v411_v22  ;;  %v413_v17 = vpack.c.bf16 %v411_v22, %v411_v22 }
 0x3e3   : > { %1700 = vmatmul.mubr.msk.bf16.vlgmr.msra.gmra.mrb[4].mxu0 %vm400_vm4, %v413_v17  ;;  %v655_v15 = vpop.xlane.xlu0 %654 }
 0x3e4   : > { %1710 = vmatpush3.bf16.msra.mxu0 %v541_v18  ;;  %1934 = vrcp.f32 %v655_v15  ;;  %1711 = vmatprep.mubr.msk.bf16.mxu0 %vm2142_vm0, %v2141_v0 }
 0x3e5   : > { %1721 = vmatprep.subr.bf16.mxu0 %v2141_v0 }
 0x3e6   : > { %v1933_v23 = vpop.eup %1932 }
 0x3e7   : > { %v531_v24 = vmul.f32 %v1933_v23, %v2496_v13  ;;  %v788_v30 = vpop.permute.xlu0 %787 }
 0x3e8   : > { %v793_v32 = vsel %vm419_vm5, %v788_v30, 0 }
 0x3e9   : > { %1593 = vst.msk [vmem:[%s2535_s16 + $0x8] sm:$0xff] %vm400_vm4, %v531_v24  ;;  %v534_v25 = vpack.c.bf16 %v531_v24, %v531_v24 }
 0x3eb   : > { %v781_v27 = vpop.xlane.xlu1 %780  ;;  %1712 = vmatmul.mubr.msk.bf16.vlgmr.msra.gmra.mrb[8].mxu0 %vm400_vm4, %v534_v25 }
 0x3ec   : > { %1936 = vrcp.f32 %v781_v27  ;;  %1722 = vmatpush3.bf16.msra.mxu0 %v667_v26  ;;  %1723 = vmatprep.mubr.msk.bf16.mxu0 %vm2142_vm0, %v2141_v0  ;;  %v1912_v27 = vld [vmem:[#allocation9] sm:$0xff]  }
 0x3ed   : > { %1733 = vmatprep.subr.bf16.mxu0 %v2141_v0  ;;  %1788 = vmatpush3.bf16.msra.mxu1 %v1912_v27 }
 0x3ee   : > { %v1935_v28 = vpop.eup %1934  ;;  %1789 = vmatprep.subr.bf16.mxu1 %v2141_v0 }
 0x3ef   : > { %v657_v29 = vmul.f32 %v1935_v28, %v2500_v48 }
 0x3f1   : > { %1598 = vst.msk [vmem:[%s2535_s16 + $0x10] sm:$0xff] %vm400_vm4, %v657_v29  ;;  %v660_v31 = vpack.c.bf16 %v657_v29, %v657_v29  ;;  %v1913_v29 = vld [vmem:[#allocation9 + $0x8] sm:$0xff]  }
 0x3f2   : > { %1790 = vmatpush3.bf16.msra.mxu1 %v1913_v29 }
 0x3f3   : > { %v907_v33 = vpop.xlane.xlu1 %906  ;;  %1724 = vmatmul.mubr.msk.bf16.vlgmr.msra.gmra.mrb[12].mxu0 %vm400_vm4, %v660_v31 }
 0x3f4   : > { %1938 = vrcp.f32 %v907_v33  ;;  %1734 = vmatpush3.bf16.msra.mxu0 %v793_v32  ;;  %1735 = vmatprep.mubr.msk.bf16.mxu0 %vm2142_vm0, %v2141_v0 }
 0x3f5   : > { %1745 = vmatprep.subr.bf16.mxu0 %v2141_v0 }
 0x3f6   : > { %v1937_v34 = vpop.eup %1936 }
 0x3f7   : > { %v783_v35 = vmul.f32 %v1937_v34, %v2504_v53 }
 0x3f9   : > { %1603 = vst.msk [vmem:[%s2535_s16 + $0x18] sm:$0xff] %vm400_vm4, %v783_v35  ;;  %v786_v36 = vpack.c.bf16 %v783_v35, %v783_v35 }
 0x3fb   : > { %1736 = vmatmul.mubr.msk.bf16.vlgmr.msra.gmra.mrb[16].mxu0 %vm400_vm4, %v786_v36 }
 0x3fc   : > { %1747 = vmatprep.mubr.msk.bf16.mxu0 %vm2142_vm0, %v2141_v0 }
 0x3fe   : > { %v1939_v37 = vpop.eup %1938 }
 0x3ff   : > { %v909_v38 = vmul.f32 %v1939_v37, %v2508_v55 }
 0x401   : > { %1608 = vst.msk [vmem:[%s2535_s16 + $0x20] sm:$0xff] %vm400_vm4, %v909_v38  ;;  %v912_v46 = vpack.c.bf16 %v909_v38, %v909_v38 }
 0x403   : > { %v1159_v39 = vpop.xlane.xlu1 %1158 }
 0x404   : > { %1940 = vrcp.f32 %v1159_v39 }
 0x40e   : > { %v1941_v10 = vpop.eup %1940 }
 0x40f   : > { %v1161_v40 = vmul.f32 %v1941_v10, %v2515_v63 }
 0x411   : > { %1618 = vst.msk [vmem:[%s2535_s16 + $0x30] sm:$0xff] %vm400_vm4, %v1161_v40  ;;  %v1164_v54 = vpack.c.bf16 %v1161_v40, %v1161_v40 }
 0x418   : > { %v1033_v12 = vpop.xlane.xlu0 %1032 }
 0x419   : > { %1942 = vrcp.f32 %v1033_v12 }
 0x41c   : > { %v1040_v43 = vpop.permute.xlu0 %1039 }
 0x41d   : > { %v1045_v47 = vsel %vm419_vm5, %v1040_v43, 0 }
 0x420   : > { %v1166_v50 = vpop.permute.xlu0 %1165 }
 0x421   : > { %v1171_v52 = vsel %vm419_vm5, %v1166_v50, 0 }
 0x423   : > { %v1943_v41 = vpop.eup %1942 }
 0x424   : > { %v1035_v42 = vmul.f32 %v1943_v41, %v2520_v4  ;;  %v1292_v53 = vpop.permute.xlu0 %1291 }
 0x425   : > { %v1297_v55 = vsel %vm419_vm5, %v1292_v53, 0 }
 0x426   : > { %1613 = vst.msk [vmem:[%s2535_s16 + $0x28] sm:$0xff] %vm400_vm4, %v1035_v42  ;;  %v1038_v51 = vpack.c.bf16 %v1035_v42, %v1035_v42 }
 0x430   : > { %v1285_v44 = vpop.xlane.xlu1 %1284 }
 0x431   : > { %1944 = vrcp.f32 %v1285_v44 }
 0x434   : > { %v914_v13 = vpop.permute.xlu1 %913 }
 0x435   : > { %v919_v45 = vsel %vm419_vm5, %v914_v13, 0 }
 0x436   : > { %1746 = vmatpush3.bf16.msra.mxu0 %v919_v45 }
 0x437   : > { %1757 = vmatprep.subr.bf16.mxu0 %v2141_v0 }
 0x439   : > { %1748 = vmatmul.mubr.msk.bf16.vlgmr.msra.gmra.mrb[20].mxu0 %vm400_vm4, %v912_v46 }
 0x43a   : > { %1758 = vmatpush3.bf16.msra.mxu0 %v1045_v47  ;;  %1759 = vmatprep.mubr.msk.bf16.mxu0 %vm2142_vm0, %v2141_v0 }
 0x43b   : > { %v1945_v48 = vpop.eup %1944  ;;  %1769 = vmatprep.subr.bf16.mxu0 %v2141_v0 }
 0x43c   : > { %v1287_v49 = vmul.f32 %v1945_v48, %v2525_v9 }
 0x43e   : > { %1623 = vst.msk [vmem:[%s2535_s16 + $0x38] sm:$0xff] %vm400_vm4, %v1287_v49  ;;  %v1290_v56 = vpack.c.bf16 %v1287_v49, %v1287_v49 }
 0x441   : > { %1760 = vmatmul.mubr.msk.bf16.vlgmr.msra.gmra.mrb[24].mxu0 %vm400_vm4, %v1038_v51 }
 0x442   : > { %1770 = vmatpush3.bf16.msra.mxu0 %v1171_v52  ;;  %1771 = vmatprep.mubr.msk.bf16.mxu0 %vm2142_vm0, %v2141_v0 }
 0x443   : > { %1781 = vmatprep.subr.bf16.mxu0 %v2141_v0 }
 0x449   : > { %1772 = vmatmul.mubr.msk.bf16.vlgmr.msra.gmra.mrb[28].mxu0 %vm400_vm4, %v1164_v54 }
 0x44a   : > { %1782 = vmatpush3.bf16.msra.mxu0 %v1297_v55  ;;  %1783 = vmatprep.mubr.msk.bf16.mxu0 %vm2142_vm0, %v2141_v0 }
 0x451   : > { %1784 = vmatmul.mubr.msk.bf16.vlgmr.msra.gmra.mrb[32].mxu0 %vm400_vm4, %v1290_v56 }
 0x4b6   : > { %v457_v57 = vpop.f32.mrb[4].mxu0 }
 0x4b7   : > { %v463_v58 = vpack.c.bf16 %v457_v57, %v457_v57  ;;  %v1701_v59 = vpop.f32.mrb[5].mxu0 }
 0x4b8   : > { %v460_v60 = vpop.f32.mrb[6].mxu0 }
 0x4b9   : > { %465 = vst.msk [vmem:[#allocation3] sm:$0xf] %vm464_vm6, %v463_v58  ;;  %v1702_v61 = vpop.f32.mrb[7].mxu0 }
 0x4be   : > { %v577_v62 = vpop.f32.mrb[8].mxu0 }
 0x4bf   : > { %v1637_v63 = vpack.c.bf16 %v577_v62, %v577_v62  ;;  %v1713_v1 = vpop.f32.mrb[9].mxu0 }
 0x4c0   : > { %v580_v2 = vpop.f32.mrb[10].mxu0 }
 0x4c1   : > { %587 = vrot.lane.b32.xlu1 %v1637_v63, %s2166_s9  ;;  %v1714_v3 = vpop.f32.mrb[11].mxu0  ;;  %s2032_s9 = scalar_lea.vmem %s2605_s30, 1024 }
 0x4c2   : > { %p2033_p11 = scmp.ne.s32.totalorder %s2605_s30, %s2032_s9 }
 0x4c4   : > { %p2034_p1 = pnand %p2033_p11, %p2705_p0 }
 0x4c6   : > { %v703_v4 = vpop.f32.mrb[12].mxu0  ;;  %p2035_p3 = pneg %p2034_p1 }
 0x4c7   : > { %v1638_v5 = vpack.c.bf16 %v703_v4, %v703_v4  ;;  %v1725_v14 = vpop.f32.mrb[13].mxu0 }
 0x4c8   : > { %v706_v6 = vpop.f32.mrb[14].mxu0 }
 0x4c9   : > { %713 = vrot.lane.b32.xlu0 %v1638_v5, %s2167_s29  ;;  %v1726_v7 = vpop.f32.mrb[15].mxu0 }
 0x4ce   : > { %v829_v8 = vpop.f32.mrb[16].mxu0 }
 0x4cf   : > { %v1639_v9 = vpack.c.bf16 %v829_v8, %v829_v8  ;;  %v1737_v11 = vpop.f32.mrb[17].mxu0 }
 0x4d0   : > { %v832_v19 = vpop.f32.mrb[18].mxu0 }
 0x4d1   : > { %839 = vrot.lane.b32.xlu1 %v1639_v9, %s2168_s17  ;;  %v1738_v20 = vpop.f32.mrb[19].mxu0  ;;  %s2173_s17 = smov [#allocation11]  }
 0x50c   : > { %v955_v21 = vpop.f32.mrb[20].mxu0 }
 0x50d   : > { %v1640_v16 = vpack.c.bf16 %v955_v21, %v955_v21  ;;  %v1749_v22 = vpop.f32.mrb[21].mxu0 }
 0x50e   : > { %v958_v17 = vpop.f32.mrb[22].mxu0 }
 0x50f   : > { %965 = vrot.lane.b32.xlu0 %v1640_v16, %s2169_s24  ;;  %v1750_v18 = vpop.f32.mrb[23].mxu0  ;;  %s2036_s24 = sshll.u32 %s2173_s17, 4  ;;  %s2037_s24 = int_to_ptr.vmem [resolvable:$false] %s2036_s24 }
 0x510   : > { %p2039_p7 = scmp.lt.s32.totalorder %s2605_s30, %s2037_s24 }
 0x514   : > { %v1081_v15 = vpop.f32.mrb[24].mxu0 }
 0x515   : > { %v1641_v23 = vpack.c.bf16 %v1081_v15, %v1081_v15  ;;  %v1761_v24 = vpop.f32.mrb[25].mxu0 }
 0x516   : > { %v1084_v25 = vpop.f32.mrb[26].mxu0 }
 0x517   : > { %1091 = vrot.lane.b32.xlu1 %v1641_v23, %s2170_s26  ;;  %v1762_v26 = vpop.f32.mrb[27].mxu0  ;;  %s2038_s26 = scalar_lea.vmem %s2037_s24, 2048 }
 0x518   : > { %p2040_p9 = scmp.lt.s32.totalorder %s2038_s26, %s2032_s9 }
 0x51a   : > { %p2041_p12 = por %p2040_p9, %p2039_p7 }
 0x51c   : > { %v1207_v28 = vpop.f32.mrb[28].mxu0  ;;  %p2042_p2 = pnand %p2041_p12, %p2035_p3 }
 0x51d   : > { %v1642_v30 = vpack.c.bf16 %v1207_v28, %v1207_v28  ;;  %v1773_v31 = vpop.f32.mrb[29].mxu0 }
 0x51e   : > { %v1210_v32 = vpop.f32.mrb[30].mxu0 }
 0x51f   : > { %1217 = vrot.lane.b32.xlu0 %v1642_v30, %s2171_s8  ;;  %v1774_v33 = vpop.f32.mrb[31].mxu0 }
 0x524   : > { %v1333_v34 = vpop.f32.mrb[32].mxu0 }
 0x525   : > { %v1643_v35 = vpack.c.bf16 %v1333_v34, %v1333_v34  ;;  %v1785_v36 = vpop.f32.mrb[33].mxu0 }
 0x526   : > { %v1336_v37 = vpop.f32.mrb[34].mxu0 }
 0x527   : > { %1343 = vrot.lane.b32.xlu1 %v1643_v35, %s2172_s10  ;;  %v1786_v38 = vpop.f32.mrb[35].mxu0 }
 0x533   : > { %v588_v39 = vpop.permute.xlu1 %587 }
 0x534   : > { %591 = vst.msk [vmem:[#allocation3] sm:$0xf] %vm590_vm7, %v588_v39 }
 0x53b   : > { %v714_v10 = vpop.permute.xlu0 %713 }
 0x53c   : > { %717 = vst.msk [vmem:[#allocation3] sm:$0xf] %vm716_vm8, %v714_v10 }
 0x543   : > { %v840_v0 = vpop.permute.xlu1 %839 }
 0x544   : > { %843 = vst.msk [vmem:[#allocation3] sm:$0xf] %vm842_vm9, %v840_v0 }
 0x581   : > { %v966_v40 = vpop.permute.xlu0 %965 }
 0x582   : > { %969 = vst.msk [vmem:[#allocation3] sm:$0xf] %vm968_vm10, %v966_v40 }
 0x589   : > { %v1092_v12 = vpop.permute.xlu1 %1091 }
 0x58a   : > { %1095 = vst.msk [vmem:[#allocation3] sm:$0xf] %vm1094_vm11, %v1092_v12 }
 0x591   : > { %v1218_v41 = vpop.permute.xlu0 %1217 }
 0x592   : > { %1221 = vst.msk [vmem:[#allocation3] sm:$0xf] %vm1220_vm12, %v1218_v41 }
 0x599   : > { %v1344_v42 = vpop.permute.xlu1 %1343 }
 0x59a   : > { %1347 = vst.msk [vmem:[#allocation3] sm:$0xf] %vm1346_vm13, %v1344_v42 }
 0x5a1   : > { %v1348_v44 = vld [vmem:[#allocation3] sm:$0xf] }
 0x5a2   : > { %1792 = vmatmul.mubr.msk.bf16.vlgmr.msra.gmra.mrb[32].mxu1 %vm299_vm1, %v1348_v44 }
 0x5a3   : > { %2045 = shalt.err (!%p2042_p2)
}
 0x5a4   : > { %s2046_s16 = scalar_lea.hbm %s2602_s6, 1024  ;;  %s2050_s11 = scalar_lea.hbm %s2691_s5, 2048 }
 0x5a5   : > { %p2047_p13 = scmp.ne.s32.totalorder %s2602_s6, %s2046_s16  ;;  %p2051_p4 = scmp.lt.u32.totalorder %s2602_s6, %s2691_s5 }
 0x5a6   : > { %p2052_p5 = scmp.lt.u32.totalorder %s2050_s11, %s2046_s16  ;;  %p2054_p11 = scmp.lt.u32.totalorder %s2046_s16, %s2602_s6 }
 0x5a7   : > { %p2048_p6 = pnand %p2047_p13, %p2705_p0 }
 0x5a8   : > { %p2053_p8 = por %p2052_p5, %p2051_p4 }
 0x5a9   : > { %p2049_p10 = pneg %p2048_p6 }
 0x5aa   : > { %p2055_p1 = por %p2054_p11, %p2053_p8 }
 0x5ac   : > { %p2056_p3 = pnand %p2055_p1, %p2049_p10 }
 0x5ae   : > { %2059 = shalt.err (!%p2056_p3)
}
 0x5af   : > { %s2174_s9 = smov 128   ;;  %v1626_v13 = vld [vmem:[%s2689_s3] ss:$0 sm:$0xff]  ;;  %s1632_s26 = sshll.u32 %s2227_s22, 7 }
 0x5b0   : > { %1806 = dma.vmem_to_hbm [thread:$0]  (%p2705_p0), %s2605_s30, 1024, %s2602_s6, %s1422_s15, %s2174_s9, %s2174_s9, %s2167_s29  }
 0x5b1   : > { %s272_s16 = scalar_lea.vmem [#allocation10], %s1580_s13  ;;  %s2641_s28 = scalar_lea.hbm %s2690_s4, %s1632_s26 }
 0x5b2   : > { %s1435_s8 = sshll.u32 %s272_s16, 4  ;;  %s1417_s22 = scalar_lea.sflag [#allocation6], %s2375_s12  ;;  %s2643_s8 = int_to_ptr.vmem [resolvable:$true] %s1435_s8 }
 0x5b3   : > { %s2060_s13 = scalar_lea.vmem %s2643_s8, 128  ;;  %s2175_s29 = smov [#allocation10]  }
 0x5b4   : > { %p2061_p7 = scmp.ne.s32.totalorder %s2643_s8, %s2060_s13  ;;  %s2064_s6 = sshll.u32 %s2175_s29, 4  ;;  %s2065_s6 = int_to_ptr.vmem [resolvable:$false] %s2064_s6 }
 0x5b5   : > { %s2066_s30 = scalar_lea.vmem %s2065_s6, 256  ;;  %p2067_p2 = scmp.lt.s32.totalorder %s2643_s8, %s2065_s6 }
 0x5b6   : > { %p2062_p9 = pnand %p2061_p7, %p2705_p0  ;;  %p2068_p13 = scmp.lt.s32.totalorder %s2066_s30, %s2060_s13 }
 0x5b8   : > { %p2063_p12 = pneg %p2062_p9  ;;  %p2069_p6 = por %p2068_p13, %p2067_p2 }
 0x5ba   : > { %p2070_p10 = pnand %p2069_p6, %p2063_p12 }
 0x675   : > { %v1409_v45 = vpop.f32.mrb[32].mxu1 }
 0x676   : > { %v1410_v43 = vadd.f32 %v1626_v13, %v1409_v45  ;;  %v1793_v46 = vpop.f32.mrb[33].mxu1 }
 0x677   : > { %v1412_v47 = vpop.f32.mrb[34].mxu1 }
 0x678   : > { %v1794_v48 = vpop.f32.mrb[35].mxu1  ;;  %1415 = vst.msk [vmem:[%s272_s16] sm:$0xff] %vm299_vm1, %v1410_v43 }
 0x679   : > { %2073 = shalt.err (!%p2070_p10)
}
 0x67a   : > { %s2074_s12 = scalar_lea.hbm %s2641_s28, 128  ;;  %s2078_s9 = scalar_lea.hbm %s2690_s4, 256 }
 0x67b   : > { %p2075_p4 = scmp.ne.s32.totalorder %s2641_s28, %s2074_s12  ;;  %p2079_p11 = scmp.lt.u32.totalorder %s2641_s28, %s2690_s4 }
 0x67c   : > { %p2080_p1 = scmp.lt.u32.totalorder %s2078_s9, %s2074_s12  ;;  %p2082_p7 = scmp.lt.u32.totalorder %s2074_s12, %s2641_s28 }
 0x67d   : > { %p2076_p5 = pnand %p2075_p4, %p2705_p0 }
 0x67e   : > { %p2081_p3 = por %p2080_p1, %p2079_p11 }
 0x67f   : > { %p2077_p8 = pneg %p2076_p5 }
 0x680   : > { %p2083_p9 = por %p2082_p7, %p2081_p3 }
 0x682   : > { %p2084_p12 = pnand %p2083_p9, %p2077_p8 }
 0x684   : > { %2087 = shalt.err (!%p2084_p12)
}
 0x685   : > { %1805 = dma.vmem_to_hbm [thread:$0]  (%p2705_p0), %s2643_s8, 128, %s2641_s28, %s1417_s22  }
 0x686 PF: > { %s1463_s26 = sand.u32 1, %s2122_s18   ;;  %p2706_p2 = scmp.ne.s32.totalorder %s2696_s25, 0 }
 0x687   : > { %p2707_p13 = scmp.ge.s32.totalorder %s2134_s21, 2  ;;  %s1464_s16 = scalar_lea.sflag [#allocation6], %s1463_s26 }
 0x689   : > { %p1821_p6 = pnand %p2707_p13, %p2706_p2 }
 0x68b   : > { %2113 = dma.done.wait (!%p1821_p6), %s1464_s16, 128  }
 0x68c   : > { %2115 = vsyncadd (!%p1821_p6), %s1464_s16, 4294967168  ;;  %s1473_s10 = scalar_lea.sflag [#allocation12], %s1463_s26 }
 0x68d   : > { %2117 = dma.done.wait (!%p1821_p6), %s1473_s10, 1024  }
 0x68e   : > { %2119 = vsyncadd (!%p1821_p6), %s1473_s10, 4294966272  ;;  %p23_p0 = scmp.ge.s32.totalorder %s2316_s14, 4   ;;  %s2708_s18 = smov %s2126_s19 }
 0x68f   : > { %s2709_s19 = smov %s2130_s20  ;;  %s2710_s20 = smov %s2332_s27 }
 0x690   : > { %s2711_s21 = smov %s2316_s14  ;;  %25 = sbr.rel (!%p23_p0) target bundleno = 8 (0x8), region = 113 }
 0x697   :  { %1478 = vsyncpa [#allocation5], 1 }
 0x698   :  { %1480 = vsyncpa [#allocation5 + $0x1], 1 }
 0x699   :  { %1481 = vsyncpa [#allocation8], 1 }
 0x69a   :  { %1482 = vsyncpa [#allocation6], 1 }
 0x69b   :  { %1484 = vsyncpa [#allocation6 + $0x1], 1 }
 0x69c   :  { %1485 = vsyncpa [#allocation12], 1 }
 0x69d   :  { %1487 = vsyncpa [#allocation12 + $0x1], 1 }

</bundles_post_ra>
